<compile_context>
chip_gen: v7x
topology: tpu7x:2x2x1
jax: 0.10.0
libtpu: 0.0.40
codegen_flags: <defaults>
</compile_context>

<pallas_src>
from functools import partial

import jax
import jax.numpy as jnp
from jax.experimental import pallas as pl
from jax.experimental.pallas import tpu as pltpu

STATE_DIM = 32
ACTION_DIM = 4
HIDDEN = 100            # original PyTorch hidden size
HP = 128                # hidden padded to a full lane width
H2 = 2 * HP             # fused actor|critic hidden width
HEAD_LANES = 128        # fused head matmul width (lane-dense MXU pass)
OUT_LANES = 8           # packed output slab width (A probs + value + logp + ent + pad)


def _round_up(x, m):
    return ((x + m - 1) // m) * m


def _actor_critic_kernel(
    state_ref, action_ref,
    w1_ref, b1_ref,      # fused layer 1: (S, 256) bf16, (1, 256) f32
    w2_ref, b2_ref,      # block-diagonal layer 2: (256, 256) bf16, (1, 256) f32
    w3_ref, b3_ref,      # stacked head: (256, 128) bf16, (1, 128) f32
    out_ref,             # packed output slab (tile_b, OUT_LANES) f32
    *, action_dim, out_lanes,
):
    x = state_ref[...].astype(jnp.bfloat16)                       # (tb, S)

    # ----- three fused MXU passes: [actor | critic] ride together -----
    h1 = jnp.tanh(
        jnp.dot(x, w1_ref[...], preferred_element_type=jnp.float32) + b1_ref[...]
    )                                                             # (tb, 256) f32
    h2 = jnp.tanh(
        jnp.dot(h1.astype(jnp.bfloat16), w2_ref[...],
                preferred_element_type=jnp.float32) + b2_ref[...]
    )                                                             # (tb, 256) f32
    out_pre = (
        jnp.dot(h2.astype(jnp.bfloat16), w3_ref[...],
                preferred_element_type=jnp.float32) + b3_ref[...]
    )                                                             # (tb, 128) f32
    # lanes [0:A) = actor logits, lane A = critic value, rest = padding

    # ----- narrow 8-lane epilogue (softmax / log-softmax / entropy) -----
    head = out_pre[:, :out_lanes]                                 # (tb, 8) f32
    tb = head.shape[0]
    lane = jax.lax.broadcasted_iota(jnp.int32, (tb, out_lanes), 1)
    valid = lane < action_dim

    logits = jnp.where(valid, head, -1e30)
    m = jnp.max(logits, axis=-1, keepdims=True)
    e = jnp.exp(logits - m)                       # masked lanes underflow to exactly 0
    denom = jnp.sum(e, axis=-1, keepdims=True)
    logp_all = (logits - m) - jnp.log(denom)      # log-softmax (finite everywhere)
    probs = e / denom                             # exact normalization

    # chosen-action log-prob via iota == action compare (action < A always)
    act = action_ref[...]                                         # (tb, 1) int32
    logp = jnp.sum(jnp.where(lane == act, logp_all, 0.0), axis=-1, keepdims=True)
    # probs is exactly 0 on masked lanes and logp_all is finite there -> no 0*inf hazard
    ent = -jnp.sum(probs * logp_all, axis=-1, keepdims=True)

    # pack: lanes [0:A) probs | lane A value | lane A+1 logp | lanes >=A+2 entropy
    out_ref[...] = jnp.where(
        valid, probs,
        jnp.where(lane == action_dim, head,
                  jnp.where(lane == action_dim + 1, logp, ent)))


def init_params(key, state_dim=STATE_DIM, action_dim=ACTION_DIM, hidden=HIDDEN):
    """Deterministic PyTorch-Linear-style init (uniform +-1/sqrt(fan_in)), f32, unpadded."""
    def linear(k, fan_in, fan_out):
        kw, kb = jax.random.split(k)
        bound = 1.0 / jnp.sqrt(jnp.float32(fan_in))
        w = jax.random.uniform(kw, (fan_in, fan_out), jnp.float32, -bound, bound)
        b = jax.random.uniform(kb, (1, fan_out), jnp.float32, -bound, bound)
        return w, b

    keys = jax.random.split(key, 6)
    w1, b1 = linear(keys[0], state_dim, hidden)
    w2, b2 = linear(keys[1], hidden, hidden)
    w3, b3 = linear(keys[2], hidden, action_dim)
    wc1, bc1 = linear(keys[3], state_dim, hidden)
    wc2, bc2 = linear(keys[4], hidden, hidden)
    wc3, bc3 = linear(keys[5], hidden, 1)
    return (w1, b1, w2, b2, w3, b3, wc1, bc1, wc2, bc2, wc3, bc3)


def pack_params(params, state_dim=STATE_DIM, action_dim=ACTION_DIM, hidden=HIDDEN):
    """Fuse actor+critic into 3 padded weight matrices (call ONCE per parameter update).

    layer 1: (S, 256)    = [actor w1 (pad 100->128) | critic wc1 (pad)]
    layer 2: (256, 256)  = block-diag(actor w2, critic wc2)
    head   : (256, 128)  = rows [0:128) actor -> lanes [0:A), rows [128:256) critic -> lane A
    Weights bf16 (MXU operands), biases f32 (added to f32 accumulators).
    """
    (w1, b1, w2, b2, w3, b3, wc1, bc1, wc2, bc2, wc3, bc3) = params

    w1f = jnp.zeros((state_dim, H2), jnp.float32)
    w1f = w1f.at[:, :hidden].set(w1).at[:, HP:HP + hidden].set(wc1)
    b1f = jnp.zeros((1, H2), jnp.float32)
    b1f = b1f.at[:, :hidden].set(b1).at[:, HP:HP + hidden].set(bc1)

    w2f = jnp.zeros((H2, H2), jnp.float32)
    w2f = w2f.at[:hidden, :hidden].set(w2).at[HP:HP + hidden, HP:HP + hidden].set(wc2)
    b2f = jnp.zeros((1, H2), jnp.float32)
    b2f = b2f.at[:, :hidden].set(b2).at[:, HP:HP + hidden].set(bc2)

    w3f = jnp.zeros((H2, HEAD_LANES), jnp.float32)
    w3f = w3f.at[:hidden, :action_dim].set(w3)
    w3f = w3f.at[HP:HP + hidden, action_dim:action_dim + 1].set(wc3)
    b3f = jnp.zeros((1, HEAD_LANES), jnp.float32)
    b3f = b3f.at[:, :action_dim].set(b3).at[:, action_dim:action_dim + 1].set(bc3)

    bf = lambda a: a.astype(jnp.bfloat16)
    return (bf(w1f), b1f, bf(w2f), b2f, bf(w3f), b3f)


def actor_critic_evaluate(state, action, packed, action_dim=ACTION_DIM, *, tile_b=None):
    """Pallas-backed equivalent of ActorCritic.evaluate() (discrete actions).

    `packed` = pack_params(params) (hoisted so PPO reuses it across evaluate calls).
    Returns (action_logprobs (B,), state_values (B,1), dist_entropy (B,), action_probs (B,A)).
    """
    B, S = state.shape
    A = action_dim
    assert A + 3 <= OUT_LANES, "packed output slab too narrow for this action_dim"

    # Tile choice: >=2 grid steps (v7x dual TC), cap at 2048 rows (stays well under the
    # 32 MiB default scoped VMEM even on v7x's 64 MiB part; v5e/v6e have even more headroom).
    if tile_b is None:
        tile_b = min(2048, _round_up(pl.cdiv(B, 2), 8))
    tile_b = max(8, _round_up(min(tile_b, B), 8))
    grid = (pl.cdiv(B, tile_b),)          # ragged last block handled by Pallas

    state = state.astype(jnp.float32)                 # no host-side pad / bf16 cast
    action2 = action.reshape(B, 1).astype(jnp.int32)

    resident = lambda shape: pl.BlockSpec(shape, lambda i: (0, 0))   # VMEM-resident weights
    in_specs = [
        pl.BlockSpec((tile_b, S), lambda i: (i, 0)),     # state tile
        pl.BlockSpec((tile_b, 1), lambda i: (i, 0)),     # action tile
        resident((S, H2)), resident((1, H2)),            # fused layer 1
        resident((H2, H2)), resident((1, H2)),           # block-diagonal layer 2
        resident((H2, HEAD_LANES)), resident((1, HEAD_LANES)),  # stacked head
    ]
    out_specs = pl.BlockSpec((tile_b, OUT_LANES), lambda i: (i, 0))

    kernel = partial(_actor_critic_kernel, action_dim=A, out_lanes=OUT_LANES)

    weight_bytes = int(sum(int(p.size) * p.dtype.itemsize for p in packed))
    cost = pl.CostEstimate(
        flops=2 * B * (S * H2 + H2 * H2 + H2 * HEAD_LANES),
        transcendentals=B * (2 * H2 + OUT_LANES + 1),     # tanh x2, exp, log
        bytes_accessed=B * (S * 4 + 4 + OUT_LANES * 4) + weight_bytes,
    )

    slab = pl.pallas_call(
        kernel,
        out_shape=jax.ShapeDtypeStruct((B, OUT_LANES), jnp.float32),
        grid=grid,
        in_specs=in_specs,
        out_specs=out_specs,
        compiler_params=pltpu.CompilerParams(dimension_semantics=("parallel",)),
        cost_estimate=cost,
    )(state, action2, *packed)

    probs = slab[:, :A]
    values = slab[:, A:A + 1]
    logp = slab[:, A + 1]
    ent = slab[:, A + 2]
    return logp, values, ent, probs


def _reference_evaluate(state, action, params):
    """Pure-JAX f32 reference of ActorCritic.evaluate() (discrete branch)."""
    (w1, b1, w2, b2, w3, b3, wc1, bc1, wc2, bc2, wc3, bc3) = params
    h = jnp.tanh(state @ w1 + b1)
    h = jnp.tanh(h @ w2 + b2)
    logits = h @ w3 + b3
    probs = jax.nn.softmax(logits, axis=-1)
    logp_all = jax.nn.log_softmax(logits, axis=-1)
    onehot = jax.nn.one_hot(action, probs.shape[-1], dtype=jnp.float32)
    logp = jnp.sum(onehot * logp_all, axis=-1)
    ent = -jnp.sum(probs * logp_all, axis=-1)
    c = jnp.tanh(state @ wc1 + bc1)
    c = jnp.tanh(c @ wc2 + bc2)
    values = c @ wc3 + bc3
    return logp, values, ent, probs


if __name__ == "__main__":
    key = jax.random.PRNGKey(0)
    k_params, k_state, k_action = jax.random.split(key, 3)

    B = 200  # -> tile_b=104, 2 "parallel" grid steps, ragged last block (no host padding)
    params = init_params(k_params)
    packed = pack_params(params)   # hoisted: do this once per PPO parameter update
    state = jax.random.normal(k_state, (B, STATE_DIM), dtype=jnp.float32)
    action = jax.random.randint(k_action, (B,), 0, ACTION_DIM, dtype=jnp.int32)

    logp, values, ent, probs = actor_critic_evaluate(state, action, packed, ACTION_DIM)
    jax.block_until_ready((logp, values, ent, probs))

    # sanity check against the pure-JAX f32 reference (bf16 MXU operands -> ~1e-3 level error)
    r_logp, r_values, r_ent, r_probs = _reference_evaluate(state, action, params)
    assert jnp.allclose(logp, r_logp, atol=2e-2, rtol=2e-2)
    assert jnp.allclose(values, r_values, atol=2e-2, rtol=2e-2)
    assert jnp.allclose(ent, r_ent, atol=2e-2, rtol=2e-2)
    assert jnp.allclose(probs, r_probs, atol=2e-2, rtol=2e-2)
    assert jnp.allclose(jnp.sum(probs, axis=-1), 1.0, atol=1e-3)   # exact-divide normalization
    assert bool(jnp.all(jnp.isfinite(probs))) and bool(jnp.all(jnp.isfinite(ent)))

    # TODO(synk): Categorical.sample() in act() (stochastic) and the continuous-action
    # MultivariateNormal branch are left to the host/JAX side (jax.random.categorical over probs).
    print("KERNEL_OK")
</pallas_src>

<mosaic_0001>
module attributes {stable_mosaic.version = 11 : i64} {
  func.func @_actor_critic_kernel(%arg0: i32, %arg1: memref<104x32xf32, #tpu.memory_space<vmem>>, %arg2: memref<104x1xi32, #tpu.memory_space<vmem>>, %arg3: memref<32x256xbf16, #tpu.memory_space<vmem>>, %arg4: memref<1x256xf32, #tpu.memory_space<vmem>>, %arg5: memref<256x256xbf16, #tpu.memory_space<vmem>>, %arg6: memref<1x256xf32, #tpu.memory_space<vmem>>, %arg7: memref<256x128xbf16, #tpu.memory_space<vmem>>, %arg8: memref<1x128xf32, #tpu.memory_space<vmem>>, %arg9: memref<104x8xf32, #tpu.memory_space<vmem>>) attributes {dimension_semantics = [#tpu.dimension_semantics<parallel>], iteration_bounds = array<i64: 2>, scalar_prefetch = 0 : i64, scratch_operands = 0 : i64, tpu.core_type = #tpu.core_type<tc>, window_params = [{transform_indices = @transform_0, window_bounds = array<i64: 104, 32>}, {transform_indices = @transform_1, window_bounds = array<i64: 104, 1>}, {pipeline_mode = #tpu.pipeline_mode<synchronous>, transform_indices = @transform_2, window_bounds = array<i64: 32, 256>}, {pipeline_mode = #tpu.pipeline_mode<synchronous>, transform_indices = @transform_3, window_bounds = array<i64: 1, 256>}, {pipeline_mode = #tpu.pipeline_mode<synchronous>, transform_indices = @transform_4, window_bounds = array<i64: 256, 256>}, {pipeline_mode = #tpu.pipeline_mode<synchronous>, transform_indices = @transform_5, window_bounds = array<i64: 1, 256>}, {pipeline_mode = #tpu.pipeline_mode<synchronous>, transform_indices = @transform_6, window_bounds = array<i64: 256, 128>}, {pipeline_mode = #tpu.pipeline_mode<synchronous>, transform_indices = @transform_7, window_bounds = array<i64: 1, 128>}, {transform_indices = @transform_8, window_bounds = array<i64: 104, 8>}]} {
    %c0 = arith.constant 0 : index
    %c0_0 = arith.constant 0 : index
    %0 = vector.load %arg1[%c0, %c0_0] : memref<104x32xf32, #tpu.memory_space<vmem>>, vector<104x32xf32>
    %1 = arith.truncf %0 : vector<104x32xf32> to vector<104x32xbf16>
    %c0_1 = arith.constant 0 : index
    %c0_2 = arith.constant 0 : index
    %2 = vector.load %arg3[%c0_1, %c0_2] : memref<32x256xbf16, #tpu.memory_space<vmem>>, vector<32x256xbf16>
    %cst = arith.constant dense<0.000000e+00> : vector<104x256xf32>
    %3 = tpu.matmul %1, %2, %cst {dimension_numbers = #tpu.dot_dimension_numbers<[1], [0], [0], [1], [0, 0, 1, 1], [], []>} : vector<104x32xbf16>, vector<32x256xbf16>, vector<104x256xf32> -> vector<104x256xf32>
    %c0_3 = arith.constant 0 : index
    %c0_4 = arith.constant 0 : index
    %4 = vector.load %arg4[%c0_3, %c0_4] : memref<1x256xf32, #tpu.memory_space<vmem>>, vector<1x256xf32>
    %5 = vector.broadcast %4 : vector<1x256xf32> to vector<104x256xf32>
    %6 = arith.addf %3, %5 : vector<104x256xf32>
    %7 = math.tanh %6 : vector<104x256xf32>
    %8 = arith.truncf %7 : vector<104x256xf32> to vector<104x256xbf16>
    %c0_5 = arith.constant 0 : index
    %c0_6 = arith.constant 0 : index
    %9 = vector.load %arg5[%c0_5, %c0_6] : memref<256x256xbf16, #tpu.memory_space<vmem>>, vector<256x256xbf16>
    %cst_7 = arith.constant dense<0.000000e+00> : vector<104x256xf32>
    %10 = tpu.matmul %8, %9, %cst_7 {dimension_numbers = #tpu.dot_dimension_numbers<[1], [0], [0], [1], [0, 0, 1, 1], [], []>} : vector<104x256xbf16>, vector<256x256xbf16>, vector<104x256xf32> -> vector<104x256xf32>
    %c0_8 = arith.constant 0 : index
    %c0_9 = arith.constant 0 : index
    %11 = vector.load %arg6[%c0_8, %c0_9] : memref<1x256xf32, #tpu.memory_space<vmem>>, vector<1x256xf32>
    %12 = vector.broadcast %11 : vector<1x256xf32> to vector<104x256xf32>
    %13 = arith.addf %10, %12 : vector<104x256xf32>
    %14 = math.tanh %13 : vector<104x256xf32>
    %15 = arith.truncf %14 : vector<104x256xf32> to vector<104x256xbf16>
    %c0_10 = arith.constant 0 : index
    %c0_11 = arith.constant 0 : index
    %16 = vector.load %arg7[%c0_10, %c0_11] : memref<256x128xbf16, #tpu.memory_space<vmem>>, vector<256x128xbf16>
    %cst_12 = arith.constant dense<0.000000e+00> : vector<104x128xf32>
    %17 = tpu.matmul %15, %16, %cst_12 {dimension_numbers = #tpu.dot_dimension_numbers<[1], [0], [0], [1], [0, 0, 1, 1], [], []>} : vector<104x256xbf16>, vector<256x128xbf16>, vector<104x128xf32> -> vector<104x128xf32>
    %c0_13 = arith.constant 0 : index
    %c0_14 = arith.constant 0 : index
    %18 = vector.load %arg8[%c0_13, %c0_14] : memref<1x128xf32, #tpu.memory_space<vmem>>, vector<1x128xf32>
    %19 = vector.broadcast %18 : vector<1x128xf32> to vector<104x128xf32>
    %20 = arith.addf %17, %19 : vector<104x128xf32>
    %21 = vector.extract_strided_slice %20 {offsets = [0, 0], sizes = [104, 8], strides = [1, 1]} : vector<104x128xf32> to vector<104x8xf32>
    %22 = tpu.iota {dimensions = array<i32: 1>} : vector<104x8xi32>
    %c4_i32 = arith.constant 4 : i32
    %23 = vector.broadcast %c4_i32 : i32 to vector<104x8xi32>
    %24 = arith.cmpi slt, %22, %23 : vector<104x8xi32>
    %cst_15 = arith.constant -1.000000e+30 : f32
    %25 = vector.broadcast %cst_15 : f32 to vector<104x8xf32>
    %26 = arith.select %24, %21, %25 : vector<104x8xi1>, vector<104x8xf32>
    %cst_16 = arith.constant dense<0xFF800000> : vector<104xf32>
    %27 = vector.multi_reduction <maximumf>, %26, %cst_16 [1] : vector<104x8xf32> to vector<104xf32>
    %28 = vector.shape_cast %27 : vector<104xf32> to vector<104x1xf32>
    %29 = vector.broadcast %28 : vector<104x1xf32> to vector<104x8xf32>
    %30 = arith.subf %26, %29 : vector<104x8xf32>
    %31 = math.exp %30 : vector<104x8xf32>
    %cst_17 = arith.constant dense<0.000000e+00> : vector<104xf32>
    %32 = vector.multi_reduction <add>, %31, %cst_17 [1] : vector<104x8xf32> to vector<104xf32>
    %33 = vector.shape_cast %32 : vector<104xf32> to vector<104x1xf32>
    %34 = vector.broadcast %28 : vector<104x1xf32> to vector<104x8xf32>
    %35 = arith.subf %26, %34 : vector<104x8xf32>
    %36 = math.log %33 : vector<104x1xf32>
    %37 = vector.broadcast %36 : vector<104x1xf32> to vector<104x8xf32>
    %38 = arith.subf %35, %37 : vector<104x8xf32>
    %39 = vector.broadcast %33 : vector<104x1xf32> to vector<104x8xf32>
    %40 = arith.divf %31, %39 : vector<104x8xf32>
    %c0_18 = arith.constant 0 : index
    %c0_19 = arith.constant 0 : index
    %41 = vector.load %arg2[%c0_18, %c0_19] : memref<104x1xi32, #tpu.memory_space<vmem>>, vector<104x1xi32>
    %42 = vector.broadcast %41 : vector<104x1xi32> to vector<104x8xi32>
    %43 = arith.cmpi eq, %22, %42 : vector<104x8xi32>
    %cst_20 = arith.constant 0.000000e+00 : f32
    %44 = vector.broadcast %cst_20 : f32 to vector<104x8xf32>
    %45 = arith.select %43, %38, %44 : vector<104x8xi1>, vector<104x8xf32>
    %cst_21 = arith.constant dense<0.000000e+00> : vector<104xf32>
    %46 = vector.multi_reduction <add>, %45, %cst_21 [1] : vector<104x8xf32> to vector<104xf32>
    %47 = vector.shape_cast %46 : vector<104xf32> to vector<104x1xf32>
    %48 = arith.mulf %40, %38 : vector<104x8xf32>
    %cst_22 = arith.constant dense<0.000000e+00> : vector<104xf32>
    %49 = vector.multi_reduction <add>, %48, %cst_22 [1] : vector<104x8xf32> to vector<104xf32>
    %50 = vector.shape_cast %49 : vector<104xf32> to vector<104x1xf32>
    %cst_23 = arith.constant 0.000000e+00 : f32
    %51 = vector.broadcast %cst_23 : f32 to vector<104x1xf32>
    %52 = arith.subf %51, %50 : vector<104x1xf32>
    %c4_i32_24 = arith.constant 4 : i32
    %53 = vector.broadcast %c4_i32_24 : i32 to vector<104x8xi32>
    %54 = arith.cmpi eq, %22, %53 : vector<104x8xi32>
    %c5_i32 = arith.constant 5 : i32
    %55 = vector.broadcast %c5_i32 : i32 to vector<104x8xi32>
    %56 = arith.cmpi eq, %22, %55 : vector<104x8xi32>
    %57 = vector.shape_cast %47 : vector<104x1xf32> to vector<104x1xf32>
    %58 = vector.broadcast %57 : vector<104x1xf32> to vector<104x8xf32>
    %59 = vector.shape_cast %52 : vector<104x1xf32> to vector<104x1xf32>
    %60 = vector.broadcast %59 : vector<104x1xf32> to vector<104x8xf32>
    %61 = arith.select %56, %58, %60 : vector<104x8xi1>, vector<104x8xf32>
    %62 = arith.select %54, %21, %61 : vector<104x8xi1>, vector<104x8xf32>
    %63 = arith.select %24, %40, %62 : vector<104x8xi1>, vector<104x8xf32>
    %c0_25 = arith.constant 0 : index
    %c0_26 = arith.constant 0 : index
    %64 = vector.load %arg9[%c0_25, %c0_26] : memref<104x8xf32, #tpu.memory_space<vmem>>, vector<104x8xf32>
    tpu.vector_store %arg9[%c0_25, %c0_26], %63 {strides = array<i32>} : memref<104x8xf32, #tpu.memory_space<vmem>>, vector<104x8xf32>,
    return
  }
  func.func @transform_0(%arg0: i32) -> (i32, i32) {
    %c0_i32 = arith.constant 0 : i32
    %c0_i32_0 = arith.constant 0 : i32
    return %arg0, %c0_i32 : i32, i32
  }
  func.func @transform_1(%arg0: i32) -> (i32, i32) {
    %c0_i32 = arith.constant 0 : i32
    %c0_i32_0 = arith.constant 0 : i32
    return %arg0, %c0_i32 : i32, i32
  }
  func.func @transform_2(%arg0: i32) -> (i32, i32) {
    %c0_i32 = arith.constant 0 : i32
    %c0_i32_0 = arith.constant 0 : i32
    %c0_i32_1 = arith.constant 0 : i32
    return %c0_i32, %c0_i32_0 : i32, i32
  }
  func.func @transform_3(%arg0: i32) -> (i32, i32) {
    %c0_i32 = arith.constant 0 : i32
    %c0_i32_0 = arith.constant 0 : i32
    %c0_i32_1 = arith.constant 0 : i32
    return %c0_i32, %c0_i32_0 : i32, i32
  }
  func.func @transform_4(%arg0: i32) -> (i32, i32) {
    %c0_i32 = arith.constant 0 : i32
    %c0_i32_0 = arith.constant 0 : i32
    %c0_i32_1 = arith.constant 0 : i32
    return %c0_i32, %c0_i32_0 : i32, i32
  }
  func.func @transform_5(%arg0: i32) -> (i32, i32) {
    %c0_i32 = arith.constant 0 : i32
    %c0_i32_0 = arith.constant 0 : i32
    %c0_i32_1 = arith.constant 0 : i32
    return %c0_i32, %c0_i32_0 : i32, i32
  }
  func.func @transform_6(%arg0: i32) -> (i32, i32) {
    %c0_i32 = arith.constant 0 : i32
    %c0_i32_0 = arith.constant 0 : i32
    %c0_i32_1 = arith.constant 0 : i32
    return %c0_i32, %c0_i32_0 : i32, i32
  }
  func.func @transform_7(%arg0: i32) -> (i32, i32) {
    %c0_i32 = arith.constant 0 : i32
    %c0_i32_0 = arith.constant 0 : i32
    %c0_i32_1 = arith.constant 0 : i32
    return %c0_i32, %c0_i32_0 : i32, i32
  }
  func.func @transform_8(%arg0: i32) -> (i32, i32) {
    %c0_i32 = arith.constant 0 : i32
    %c0_i32_0 = arith.constant 0 : i32
    return %arg0, %c0_i32 : i32, i32
  }
}

</mosaic_0001>

<bundles_post_ra>
// kernel: tpu_custom_call.1
= control target key start
LH: loop header
LB: loop body
LE: loop exit
PB: predicated region body
PF: predicated region fallthrough
CT: control target
= control target key end

     0   :  { %s2489_s27 = smov 0   ;;  %s2491_s28 = smov 0   ;;  %s3421_s0 = inlined_call_operand.vmem [shape: f32[200,32], index: 0, kind: input, shape index: {}]   ;;  %s3422_s1 = inlined_call_operand.vmem [shape: s32[200,1], index: 1, kind: input, shape index: {}]   ;;  %s3423_s2 = inlined_call_operand.vmem [shape: bf16[32,256], index: 2, kind: input, shape index: {}]   ;;  %s3424_s3 = inlined_call_operand.vmem [shape: f32[1,256], index: 3, kind: input, shape index: {}]   ;;  %s3425_s4 = inlined_call_operand.vmem [shape: bf16[256,256], index: 4, kind: input, shape index: {}]   ;;  %s3426_s5 = inlined_call_operand.vmem [shape: f32[1,256], index: 5, kind: input, shape index: {}]   ;;  %s3427_s6 = inlined_call_operand.vmem [shape: bf16[256,128], index: 6, kind: input, shape index: {}]   ;;  %s3428_s7 = inlined_call_operand.vmem [shape: f32[1,128], index: 7, kind: input, shape index: {}]   ;;  %s3429_s8 = inlined_call_operand.vmem [shape: f32[200,8], index: 8, kind: output, shape index: {}]  }
   0x1   :  { %s2493_s29 = smov 0  }
   0x2 LB: > { %s2502_s30 = sadd.s32 4294967295, %s2409_s29   ;;  %s2504_s9 = sadd.s32 1, %s2409_s29   ;;  %s2409_s29 = sphi %s2493_s29, %s3436_s29   ;;  %s2405_s28 = sphi %s2491_s28, %s3435_s28   ;;  %s2401_s27 = sphi %s2489_s27, %s3434_s27  }
   0x3   : > { %s200_s10 = ssub.s32 %s2409_s29, %s2504_s9  ;;  %s203_s11 = sadd.s32 1, %s2405_s28 }
   0x4   : > { %p201_p0 = scmp.eq.s32.totalorder %s200_s10, 0  ;;  %p213_p1 = scmp.ne.s32.totalorder %s2405_s28, %s2401_s27 }
   0x5   : > { %p214_p2 = scmp.eq.s32.totalorder %s2502_s30, 1  ;;  %p1872_p3 = scmp.ge.s32.totalorder %s2409_s29, 1 }
   0x6   : > { %s2512_s12 = scalar_select %p201_p0, %s2405_s28, %s203_s11  }
   0x7   : > { %p2514_p4 = por %p214_p2, %p213_p1  ;;  %p290_p5 = scmp.lt.s32.totalorder %s2409_s29, 3 }
   0x9   : > { %p291_p6 = pnand %p1872_p3, %p290_p5 }
   0xa   : > { %v2099_v0 = vld [vmem:[%s3423_s2 + $0x4] ss:$8 sps:$4 sm:$0xff] (!%p291_p6)   ;;  %s2522_s16 = smul.u32 (!%p291_p6), 13, %s2502_s30  ;;  %v2101_v1 = vld [vmem:[%s3423_s2] ss:$8 sps:$4 sm:$0xff] (!%p291_p6)   ;;  %v2443_v2 = vmov (!%p291_p6), 0  }
   0xb   : > { %294 = sbr.rel (%p291_p6) target bundleno = 1283 (0x503), region = 52  ;;  %480 = vmatprep.mubr.bf16.mxu0 (!%p291_p6), %v2443_v2  ;;  %2098 = vset.pattern.permute.xlu1 (!%p291_p6), %v2443_v2  ;;  %v2102_v3 = vld [vmem:[%s3423_s2 + $0x14] ss:$8 sps:$4 sm:$0xff] (!%p291_p6)   ;;  %v2104_v4 = vld [vmem:[%s3423_s2 + $0x10] ss:$8 sps:$4 sm:$0xff] (!%p291_p6)   ;;  %vm426_vm0 = vcmask (!%p291_p6), 261120  }
   0xc   : > { %448 = vmatprep.subr.bf16.mxu0 (!%p291_p6), %v2099_v0  ;;  %p341_p7 = scmp.lt.s32.totalorder (!%p291_p6), %s2522_s16, 24  ;;  %2097 = vset.pattern.permute.xlu0 (!%p291_p6), %v2443_v2  ;;  %v2105_v5 = vld [vmem:[%s3425_s4 + $0x4] ss:$8 sps:$4 sm:$0xff] (!%p291_p6)   ;;  %v2107_v6 = vld [vmem:[%s3425_s4] ss:$8 sps:$4 sm:$0xff] (!%p291_p6)   ;;  %v2157_v61 = vld [vmem:[%s3427_s6 + $0x50] sm:$0xff] (!%p291_p6)  }
   0xd   : > { %449 = vmatpush1.bf16.msra.mxu0 (!%p291_p6), %v2101_v1  ;;  %v2108_v7 = vld [vmem:[%s3425_s4 + $0x14] ss:$8 sps:$4 sm:$0xff] (!%p291_p6)   ;;  %793 = vmatprep.subr.bf16.mxu1 (!%p291_p6), %v2105_v5  ;;  %v2110_v8 = vld [vmem:[%s3425_s4 + $0x10] ss:$8 sps:$4 sm:$0xff] (!%p291_p6)   ;;  %v2111_v9 = vld [vmem:[%s3425_s4 + $0x24] ss:$8 sps:$4 sm:$0xff] (!%p291_p6)   ;;  %v396_v5 = vlaneseq (!%p291_p6) }
   0xe   : > { %450 = vmatprep.subr.bf16.mxu0 (!%p291_p6), %v2102_v3  ;;  %794 = vmatpush1.bf16.msra.mxu1 (!%p291_p6), %v2107_v6  ;;  %v2113_v13 = vld [vmem:[%s3425_s4 + $0x20] ss:$8 sps:$4 sm:$0xff] (!%p291_p6)   ;;  %v2114_v15 = vld [vmem:[%s3425_s4 + $0x34] ss:$8 sps:$4 sm:$0xff] (!%p291_p6)   ;;  %v2116_v17 = vld [vmem:[%s3425_s4 + $0x30] ss:$8 sps:$4 sm:$0xff] (!%p291_p6)  }
   0xf   : > { %795 = vmatprep.subr.bf16.mxu1 (!%p291_p6), %v2108_v7  ;;  %v2117_v19 = vld [vmem:[%s3425_s4 + $0x44] ss:$8 sps:$4 sm:$0xff] (!%p291_p6)   ;;  %v2119_v21 = vld [vmem:[%s3425_s4 + $0x40] ss:$8 sps:$4 sm:$0xff] (!%p291_p6)   ;;  %v2120_v22 = vld [vmem:[%s3425_s4 + $0x54] ss:$8 sps:$4 sm:$0xff] (!%p291_p6)  }
  0x10   : > { %v2122_v24 = vld [vmem:[%s3425_s4 + $0x50] ss:$8 sps:$4 sm:$0xff] (!%p291_p6)   ;;  %v2123_v25 = vld [vmem:[%s3425_s4 + $0x64] ss:$8 sps:$4 sm:$0xff] (!%p291_p6)   ;;  %v2125_v27 = vld [vmem:[%s3425_s4 + $0x60] ss:$8 sps:$4 sm:$0xff] (!%p291_p6)  }
  0x11   : > { %451 = vmatpush1.bf16.msra.mxu0 (!%p291_p6), %v2104_v4  ;;  %v2126_v28 = vld [vmem:[%s3425_s4 + $0x74] ss:$8 sps:$4 sm:$0xff] (!%p291_p6)   ;;  %v2128_v31 = vld [vmem:[%s3425_s4 + $0x70] ss:$8 sps:$4 sm:$0xff] (!%p291_p6)   ;;  %v2129_v32 = vld [vmem:[%s3425_s4 + $0x84] ss:$8 sps:$4 sm:$0xff] (!%p291_p6)  }
  0x12   : > { %s2544_s29 = scalar_select %p341_p7, %s2522_s16, 24  ;;  %796 = vmatpush1.bf16.msra.mxu1 %v2110_v8  ;;  %v2131_v34 = vld [vmem:[%s3425_s4 + $0x80] ss:$8 sps:$4 sm:$0xff]   ;;  %v2132_v35 = vld [vmem:[%s3425_s4 + $0x94] ss:$8 sps:$4 sm:$0xff]   ;;  %v2707_v6 = vshrl.u32 %v396_v5, 7 }
  0x13   : > { %797 = vmatprep.subr.bf16.mxu1 %v2111_v9  ;;  %v2134_v38 = vld [vmem:[%s3425_s4 + $0x90] ss:$8 sps:$4 sm:$0xff]   ;;  %v2135_v40 = vld [vmem:[%s3425_s4 + $0xa4] ss:$8 sps:$4 sm:$0xff]   ;;  %v2137_v41 = vld [vmem:[%s3425_s4 + $0xa0] ss:$8 sps:$4 sm:$0xff]  }
  0x14   : > { %s1873_s14 = sshll.u32 %s2544_s29, 3  ;;  %v2138_v47 = vld [vmem:[%s3425_s4 + $0xb4] ss:$8 sps:$4 sm:$0xff]   ;;  %v2140_v48 = vld [vmem:[%s3425_s4 + $0xb0] ss:$8 sps:$4 sm:$0xff]   ;;  %v2153_v57 = vld [vmem:[%s3427_s6 + $0x40] sm:$0xff]  }
  0x15   : > { %s2558_s20 = scalar_lea.vmem %s3421_s0, %s1873_s14  ;;  %v2141_v49 = vld [vmem:[%s3425_s4 + $0xc4] ss:$8 sps:$4 sm:$0xff]   ;;  %v2143_v50 = vld [vmem:[%s3425_s4 + $0xc0] ss:$8 sps:$4 sm:$0xff]   ;;  %v2144_v51 = vld [vmem:[%s3425_s4 + $0xd4] ss:$8 sps:$4 sm:$0xff]   ;;  %1948 = vmatprep.subr.bf16.mxu0 %v2153_v57  ;;  %s2765_s25 = scalar_lea.vmem %s3422_s1, %s1873_s14 }
  0x16   : > { %v370_v10 = vld [vmem:[%s2558_s20] sm:$0xff]  ;;  %v371_v11 = vld [vmem:[%s2558_s20 + $0x8] sm:$0xff]  ;;  %v372_v14 = vld [vmem:[%s2558_s20 + $0x10] sm:$0xff]  ;;  %798 = vmatpush1.bf16.msra.mxu1 %v2113_v13  ;;  %v398_v7 = vsub.s32 0, %v2707_v6  ;;  %v402_v9 = vsub.s32 1, %v2707_v6  ;;  %vm1173_vm2 = vcmask 64512  }
  0x17   : > { %v383_v12 = vpack.c.bf16 %v371_v11, %v370_v10  ;;  %v373_v16 = vld [vmem:[%s2558_s20 + $0x18] sm:$0xff]  ;;  %799 = vmatprep.subr.bf16.mxu1 %v2114_v15  ;;  %v374_v20 = vld [vmem:[%s2558_s20 + $0x20] sm:$0xff]  ;;  %v375_v23 = vld [vmem:[%s2558_s20 + $0x28] sm:$0xff]  ;;  %s333_s11 = sand.u32 1, %s2401_s27   ;;  %s1600_s15 = ssub.s32 (%p2514_p4), 25, %s2522_s16 }
  0x18   : > { %v384_v18 = vpack.c.bf16 %v373_v16, %v372_v14  ;;  %v385_v26 = vpack.c.bf16 %v375_v23, %v374_v20  ;;  %v376_v29 = vld [vmem:[%s2558_s20 + $0x30] sm:$0xff]  ;;  %v377_v30 = vld [vmem:[%s2558_s20 + $0x38] sm:$0xff]  ;;  %v378_v36 = vld [vmem:[%s2558_s20 + $0x40] sm:$0xff]  ;;  %s1947_s17 = smul.u32 (%p2514_p4), 104, %s2502_s30  ;;  %p1601_p8 = scmp.lt.s32.totalorder (%p2514_p4), %s1600_s15, 13 }
  0x19   : > { %1879 = vmatmul.mubr.msk.bf16.vlgmr.msra.gmra.mrb[0].mxu0 %vm426_vm0, %v383_v12  ;;  %v386_v33 = vpack.c.bf16 %v377_v30, %v376_v29  ;;  %v379_v37 = vld [vmem:[%s2558_s20 + $0x48] sm:$0xff]  ;;  %v380_v42 = vld [vmem:[%s2558_s20 + $0x50] sm:$0xff]  ;;  %v381_v43 = vld [vmem:[%s2558_s20 + $0x58] sm:$0xff] }
  0x1a   : > { %490 = vmatprep.mubr.bf16.mxu0 %v2443_v2  ;;  %800 = vmatpush1.bf16.msra.mxu1 %v2116_v17  ;;  %v387_v39 = vpack.c.bf16 %v379_v37, %v378_v36  ;;  %v388_v44 = vpack.c.bf16 %v381_v43, %v380_v42  ;;  %v382_v45 = vld [vmem:[%s2558_s20 + $0x60] sm:$0xff]  ;;  %v2146_v52 = vld [vmem:[%s3425_s4 + $0xd0] ss:$8 sps:$4 sm:$0xff]   ;;  %v2150_v55 = vld [vmem:[%s3425_s4 + $0xf4] ss:$8 sps:$4 sm:$0xff]   ;;  %s2006_s20 = smul.u32 104, %s333_s11  ;;  %s3339_s21 = scalar_lea.vmem (%p2514_p4), %s3429_s8, %s1947_s17  }
  0x1b   : > { %801 = vmatprep.subr.bf16.mxu1 %v2117_v19  ;;  %v389_v46 = vpack.c.bf16 %v382_v45, %v382_v45  ;;  %v2147_v53 = vld [vmem:[%s3425_s4 + $0xe4] ss:$8 sps:$4 sm:$0xff]   ;;  %v2149_v54 = vld [vmem:[%s3425_s4 + $0xe0] ss:$8 sps:$4 sm:$0xff]   ;;  %v2152_v56 = vld [vmem:[%s3425_s4 + $0xf0] ss:$8 sps:$4 sm:$0xff]  }
  0x1c   : > { %v2154_v58 = vld [vmem:[%s3427_s6] sm:$0xff]   ;;  %v2155_v59 = vld [vmem:[%s3427_s6 + $0x48] sm:$0xff]   ;;  %v2158_v62 = vld [vmem:[%s3427_s6 + $0x10] sm:$0xff]   ;;  %s3208_s27 = scalar_lea.vmem [#allocation2], %s2006_s20  }
  0x1d   : > { %1949 = vmatpush3.bf16.msra.mxu0 %v2154_v58  ;;  %v2156_v60 = vld [vmem:[%s3427_s6 + $0x8] sm:$0xff]   ;;  %v2159_v63 = vld [vmem:[%s3427_s6 + $0x58] sm:$0xff]   ;;  %v2161_v1 = vld [vmem:[%s3427_s6 + $0x60] sm:$0xff]  }
  0x1e   : > { %802 = vmatpush1.bf16.msra.mxu1 %v2119_v21  ;;  %1950 = vmatprep.subr.bf16.mxu0 %v2155_v59  ;;  %v2160_v0 = vld [vmem:[%s3427_s6 + $0x18] sm:$0xff]   ;;  %v2163_v3 = vld [vmem:[%s3427_s6 + $0x68] sm:$0xff]   ;;  %v394_v8 = vld [vmem:[%s3424_s3] sm:$0x3] }
  0x1f   : > { %803 = vmatprep.subr.bf16.mxu1 %v2120_v22  ;;  %v2164_v4 = vld [vmem:[%s3427_s6 + $0x28] sm:$0xff]   ;;  %v2716_v10 = vrot.slane %v394_v8, %v398_v7  ;;  %v2720_v11 = vrot.slane %v394_v8, %v402_v9 }
  0x21   : > { %1880 = vmatmul.mubr.msk.bf16.gmra.mrb[4].mxu0 %vm426_vm0, %v384_v18 }
  0x22   : > { %500 = vmatprep.mubr.bf16.mxu0 %v2443_v2  ;;  %804 = vmatpush1.bf16.msra.mxu1 %v2122_v24 }
  0x23   : > { %805 = vmatprep.subr.bf16.mxu1 %v2123_v25  ;;  %1951 = vmatpush3.bf16.msra.mxu0 %v2156_v60 }
  0x24   : > { %1952 = vmatprep.subr.bf16.mxu0 %v2157_v61 }
  0x26   : > { %806 = vmatpush1.bf16.msra.mxu1 %v2125_v27 }
  0x27   : > { %807 = vmatprep.subr.bf16.mxu1 %v2126_v28  ;;  %1953 = vmatpush3.bf16.msra.mxu0 %v2158_v62 }
  0x28   : > { %1954 = vmatprep.subr.bf16.mxu0 %v2159_v63 }
  0x29   : > { %1881 = vmatmul.mubr.msk.bf16.gmra.mrb[8].mxu0 %vm426_vm0, %v385_v26 }
  0x2a   : > { %510 = vmatprep.mubr.bf16.mxu0 %v2443_v2  ;;  %808 = vmatpush1.bf16.msra.mxu1 %v2128_v31 }
  0x2b   : > { %809 = vmatprep.subr.bf16.mxu1 %v2129_v32  ;;  %1955 = vmatpush3.bf16.msra.mxu0 %v2160_v0 }
  0x2c   : > { %1956 = vmatprep.subr.bf16.mxu0 %v2161_v1 }
  0x2e   : > { %810 = vmatpush1.bf16.msra.mxu1 %v2131_v34 }
  0x2f   : > { %811 = vmatprep.subr.bf16.mxu1 %v2132_v35 }
  0x31   : > { %1882 = vmatmul.mubr.msk.bf16.gmra.mrb[12].mxu0 %vm426_vm0, %v386_v33 }
  0x32   : > { %520 = vmatprep.mubr.bf16.mxu0 %v2443_v2  ;;  %812 = vmatpush1.bf16.msra.mxu1 %v2134_v38 }
  0x33   : > { %813 = vmatprep.subr.bf16.mxu1 %v2135_v40 }
  0x36   : > { %814 = vmatpush1.bf16.msra.mxu1 %v2137_v41 }
  0x37   : > { %815 = vmatprep.subr.bf16.mxu1 %v2138_v47 }
  0x39   : > { %1883 = vmatmul.mubr.msk.bf16.gmra.mrb[16].mxu0 %vm426_vm0, %v387_v39 }
  0x3a   : > { %530 = vmatprep.mubr.bf16.mxu0 %v2443_v2  ;;  %816 = vmatpush1.bf16.msra.mxu1 %v2140_v48 }
  0x3b   : > { %817 = vmatprep.subr.bf16.mxu1 %v2141_v49 }
  0x3e   : > { %818 = vmatpush1.bf16.msra.mxu1 %v2143_v50 }
  0x3f   : > { %819 = vmatprep.subr.bf16.mxu1 %v2144_v51 }
  0x41   : > { %1884 = vmatmul.mubr.msk.bf16.gmra.mrb[20].mxu0 %vm426_vm0, %v388_v44 }
  0x42   : > { %540 = vmatprep.mubr.bf16.mxu0 %v2443_v2  ;;  %820 = vmatpush1.bf16.msra.mxu1 %v2146_v52  ;;  %v2162_v2 = vld [vmem:[%s3427_s6 + $0x20] sm:$0xff]  }
  0x43   : > { %821 = vmatprep.subr.bf16.mxu1 %v2147_v53  ;;  %1957 = vmatpush3.bf16.msra.mxu0 %v2162_v2 }
  0x44   : > { %1958 = vmatprep.subr.bf16.mxu0 %v2163_v3 }
  0x46   : > { %822 = vmatpush1.bf16.msra.mxu1 %v2149_v54 }
  0x47   : > { %823 = vmatprep.subr.bf16.mxu1 %v2150_v55  ;;  %1959 = vmatpush3.bf16.msra.mxu0 %v2164_v4 }
  0x49   : > { %1885 = vmatmul.mubr.msk.bf16.gmra.mrb[24].mxu0 %vm426_vm0, %v389_v46 }
  0x4a   : > { %824 = vmatpush1.bf16.msra.mxu1 %v2152_v56 }
  0xec   : > { %v482_v12 = vpop.f32.mrb[0].mxu0 }
  0xed   : > { %v483_v13 = vadd.f32 %v482_v12, %v2716_v10  ;;  %v484_v14 = vpop.f32.mrb[1].mxu0 }
  0xee   : > { %v485_v15 = vadd.f32 %v484_v14, %v2720_v11  ;;  %v486_v16 = vpop.f32.mrb[2].mxu0 }
  0xef   : > { %2169 = vtanh.f32 %v483_v13  ;;  %v487_v17 = vadd.f32 %v486_v16, %v2716_v10  ;;  %v488_v18 = vpop.f32.mrb[3].mxu0 }
  0xf0   : > { %2171 = vtanh.f32 %v485_v15  ;;  %v489_v19 = vadd.f32 %v488_v18, %v2720_v11 }
  0xf1   : > { %2173 = vtanh.f32 %v487_v17 }
  0xf2   : > { %2175 = vtanh.f32 %v489_v19 }
  0xf4   : > { %v492_v20 = vpop.f32.mrb[4].mxu0 }
  0xf5   : > { %v493_v21 = vadd.f32 %v492_v20, %v2716_v10  ;;  %v494_v22 = vpop.f32.mrb[5].mxu0 }
  0xf6   : > { %v495_v23 = vadd.f32 %v494_v22, %v2720_v11  ;;  %v496_v24 = vpop.f32.mrb[6].mxu0 }
  0xf7   : > { %2177 = vtanh.f32 %v493_v21  ;;  %v497_v25 = vadd.f32 %v496_v24, %v2716_v10  ;;  %v498_v26 = vpop.f32.mrb[7].mxu0 }
  0xf8   : > { %2179 = vtanh.f32 %v495_v23  ;;  %v499_v27 = vadd.f32 %v498_v26, %v2720_v11 }
  0xf9   : > { %v2170_v28 = vpop.eup %2169  ;;  %2181 = vtanh.f32 %v497_v25 }
  0xfa   : > { %v2172_v29 = vpop.eup %2171  ;;  %2183 = vtanh.f32 %v499_v27 }
  0xfb   : > { %v2174_v30 = vpop.eup %2173 }
  0xfc   : > { %v2176_v31 = vpop.eup %2175  ;;  %v502_v32 = vpop.f32.mrb[8].mxu0  ;;  %v575_v33 = vpack.c.bf16 %v2174_v30, %v2170_v28 }
  0xfd   : > { %v503_v34 = vadd.f32 %v502_v32, %v2716_v10  ;;  %v504_v35 = vpop.f32.mrb[9].mxu0  ;;  %v576_v36 = vpack.c.bf16 %v2176_v31, %v2172_v29 }
  0xfe   : > { %v505_v37 = vadd.f32 %v504_v35, %v2720_v11  ;;  %v506_v38 = vpop.f32.mrb[10].mxu0 }
  0xff   : > { %2185 = vtanh.f32 %v503_v34  ;;  %v507_v39 = vadd.f32 %v506_v38, %v2716_v10  ;;  %v508_v40 = vpop.f32.mrb[11].mxu0  ;;  %825 = vmatprep.mubr.bf16.mxu1 %v576_v36 }
 0x100   : > { %2187 = vtanh.f32 %v505_v37  ;;  %v509_v41 = vadd.f32 %v508_v40, %v2720_v11  ;;  %826 = vmatmul.mubr.bf16.vlgmr.msra.gmra.mrb[0].mxu1 %v575_v33 }
 0x101   : > { %v2178_v42 = vpop.eup %2177  ;;  %2189 = vtanh.f32 %v507_v39 }
 0x102   : > { %v2180_v43 = vpop.eup %2179  ;;  %2191 = vtanh.f32 %v509_v41 }
 0x103   : > { %v2182_v44 = vpop.eup %2181 }
 0x104   : > { %v2184_v45 = vpop.eup %2183  ;;  %v512_v46 = vpop.f32.mrb[12].mxu0  ;;  %v577_v47 = vpack.c.bf16 %v2182_v44, %v2178_v42 }
 0x105   : > { %v513_v48 = vadd.f32 %v512_v46, %v2716_v10  ;;  %v514_v49 = vpop.f32.mrb[13].mxu0  ;;  %v578_v50 = vpack.c.bf16 %v2184_v45, %v2180_v43 }
 0x106   : > { %v515_v51 = vadd.f32 %v514_v49, %v2720_v11  ;;  %v516_v52 = vpop.f32.mrb[14].mxu0  ;;  %v2168_v49 = vld [vmem:[%s3427_s6 + $0x38] sm:$0xff]  }
 0x107   : > { %2193 = vtanh.f32 %v513_v48  ;;  %v517_v53 = vadd.f32 %v516_v52, %v2716_v10  ;;  %v518_v54 = vpop.f32.mrb[15].mxu0  ;;  %835 = vmatprep.mubr.bf16.mxu1 %v578_v50  ;;  %v2167_v48 = vld [vmem:[%s3427_s6 + $0x78] sm:$0xff]   ;;  %v1357_v50 = vld [vmem:[%s2765_s25 + $0x8] sm:$0xff]  ;;  %v1356_v52 = vld [vmem:[%s2765_s25] sm:$0xff] }
 0x108   : > { %2195 = vtanh.f32 %v515_v51  ;;  %v519_v55 = vadd.f32 %v518_v54, %v2720_v11  ;;  %836 = vmatmul.mubr.bf16.gmra.mrb[4].mxu1 %v577_v47  ;;  %v2166_v47 = vld [vmem:[%s3427_s6 + $0x30] sm:$0xff]   ;;  %1373 = vperm.xlu1 %2098, %v1357_v50   ;;  %v1360_v54 = vld [vmem:[%s2765_s25 + $0x20] sm:$0xff] }
 0x109   : > { %v2186_v56 = vpop.eup %2185  ;;  %2197 = vtanh.f32 %v517_v53  ;;  %v1358_v51 = vld [vmem:[%s2765_s25 + $0x10] sm:$0xff]  ;;  %1370 = vperm.xlu0 %2097, %v1356_v52   ;;  %v1359_v53 = vld [vmem:[%s2765_s25 + $0x18] sm:$0xff] }
 0x10a   : > { %v2188_v57 = vpop.eup %2187  ;;  %2199 = vtanh.f32 %v519_v55  ;;  %v1361_v55 = vld [vmem:[%s2765_s25 + $0x28] sm:$0xff] }
 0x10b   : > { %v2190_v58 = vpop.eup %2189 }
 0x10c   : > { %v2192_v59 = vpop.eup %2191  ;;  %v522_v60 = vpop.f32.mrb[16].mxu0  ;;  %v579_v61 = vpack.c.bf16 %v2190_v58, %v2186_v56  ;;  %1376 = vperm.xlu1 %2098, %v1358_v51   ;;  %v1362_v56 = vld [vmem:[%s2765_s25 + $0x30] sm:$0xff]  ;;  %v1364_v58 = vld [vmem:[%s2765_s25 + $0x40] sm:$0xff] }
 0x10d   : > { %v523_v62 = vadd.f32 %v522_v60, %v2716_v10  ;;  %v524_v63 = vpop.f32.mrb[17].mxu0  ;;  %v580_v0 = vpack.c.bf16 %v2192_v59, %v2188_v57  ;;  %v1363_v57 = vld [vmem:[%s2765_s25 + $0x38] sm:$0xff]  ;;  %v621_v59 = vld [vmem:[%s3426_s5] sm:$0x3] }
 0x10e   : > { %v525_v1 = vadd.f32 %v524_v63, %v2720_v11  ;;  %v526_v2 = vpop.f32.mrb[18].mxu0  ;;  %v2781_v60 = vrot.slane %v621_v59, %v398_v7 }
 0x10f   : > { %2201 = vtanh.f32 %v523_v62  ;;  %v527_v3 = vadd.f32 %v526_v2, %v2716_v10  ;;  %v528_v4 = vpop.f32.mrb[19].mxu0  ;;  %845 = vmatprep.mubr.bf16.mxu1 %v580_v0 }
 0x110   : > { %2203 = vtanh.f32 %v525_v1  ;;  %v529_v8 = vadd.f32 %v528_v4, %v2720_v11  ;;  %846 = vmatmul.mubr.bf16.gmra.mrb[8].mxu1 %v579_v61  ;;  %1379 = vperm.xlu1 %2098, %v1359_v53   ;;  %v2785_v61 = vrot.slane %v621_v59, %v402_v9 }
 0x111   : > { %v2194_v12 = vpop.eup %2193  ;;  %2205 = vtanh.f32 %v527_v3 }
 0x112   : > { %v2196_v13 = vpop.eup %2195  ;;  %2207 = vtanh.f32 %v529_v8 }
 0x113   : > { %v2198_v14 = vpop.eup %2197 }
 0x114   : > { %v2200_v15 = vpop.eup %2199  ;;  %v532_v16 = vpop.f32.mrb[20].mxu0  ;;  %v581_v17 = vpack.c.bf16 %v2198_v14, %v2194_v12  ;;  %1382 = vperm.xlu1 %2098, %v1360_v54  }
 0x115   : > { %v533_v18 = vadd.f32 %v532_v16, %v2716_v10  ;;  %v534_v19 = vpop.f32.mrb[21].mxu0  ;;  %v582_v20 = vpack.c.bf16 %v2200_v15, %v2196_v13 }
 0x116   : > { %v535_v21 = vadd.f32 %v534_v19, %v2720_v11  ;;  %v536_v22 = vpop.f32.mrb[22].mxu0 }
 0x117   : > { %2209 = vtanh.f32 %v533_v18  ;;  %v537_v23 = vadd.f32 %v536_v22, %v2716_v10  ;;  %v538_v24 = vpop.f32.mrb[23].mxu0  ;;  %855 = vmatprep.mubr.bf16.mxu1 %v582_v20 }
 0x118   : > { %2211 = vtanh.f32 %v535_v21  ;;  %v539_v25 = vadd.f32 %v538_v24, %v2720_v11  ;;  %856 = vmatmul.mubr.bf16.gmra.mrb[12].mxu1 %v581_v17  ;;  %1385 = vperm.xlu1 %2098, %v1361_v55  }
 0x119   : > { %v2202_v26 = vpop.eup %2201  ;;  %2213 = vtanh.f32 %v537_v23 }
 0x11a   : > { %v2204_v27 = vpop.eup %2203  ;;  %2215 = vtanh.f32 %v539_v25 }
 0x11b   : > { %v2206_v28 = vpop.eup %2205 }
 0x11c   : > { %v2208_v29 = vpop.eup %2207  ;;  %v542_v30 = vpop.f32.mrb[24].mxu0  ;;  %v583_v31 = vpack.c.bf16 %v2206_v28, %v2202_v26  ;;  %1388 = vperm.xlu1 %2098, %v1362_v56  }
 0x11d   : > { %v543_v32 = vadd.f32 %v542_v30, %v2716_v10  ;;  %v544_v33 = vpop.f32.mrb[25].mxu0  ;;  %v584_v34 = vpack.c.bf16 %v2208_v29, %v2204_v27 }
 0x11e   : > { %v545_v35 = vadd.f32 %v544_v33, %v2720_v11  ;;  %v546_v36 = vpop.f32.mrb[26].mxu0  ;;  %v2165_v11 = vld [vmem:[%s3427_s6 + $0x70] sm:$0xff]  }
 0x11f   : > { %2217 = vtanh.f32 %v543_v32  ;;  %865 = vmatprep.mubr.bf16.mxu1 %v584_v34  ;;  %v547_v37 = vpop.f32.mrb[27].mxu0  ;;  %1960 = vmatprep.subr.bf16.mxu0 %v2165_v11 }
 0x120   : > { %2219 = vtanh.f32 %v545_v35  ;;  %866 = vmatmul.mubr.bf16.gmra.mrb[16].mxu1 %v583_v31  ;;  %1961 = vmatpush3.bf16.msra.mxu0 %v2166_v47 }
 0x121   : > { %v2210_v38 = vpop.eup %2209  ;;  %1962 = vmatprep.subr.bf16.mxu0 %v2167_v48  ;;  %1391 = vperm.xlu1 %2098, %v1363_v57  }
 0x122   : > { %v2212_v39 = vpop.eup %2211 }
 0x123   : > { %v2214_v40 = vpop.eup %2213 }
 0x124   : > { %v2216_v41 = vpop.eup %2215  ;;  %v585_v42 = vpack.c.bf16 %v2214_v40, %v2210_v38  ;;  %1963 = vmatpush3.bf16.msra.mxu0 %v2168_v49 }
 0x125   : > { %v586_v43 = vpack.c.bf16 %v2216_v41, %v2212_v39  ;;  %1394 = vperm.xlu1 %2098, %v1364_v58  }
 0x127   : > { %875 = vmatprep.mubr.bf16.mxu1 %v586_v43 }
 0x128   : > { %876 = vmatmul.mubr.bf16.gmra.mrb[20].mxu1 %v585_v42 }
 0x129   : > { %v2218_v10 = vpop.eup %2217 }
 0x12a   : > { %v2220_v44 = vpop.eup %2219  ;;  %v587_v46 = vpack.c.bf16 %v2218_v10, %v2218_v10 }
 0x12b   : > { %v588_v45 = vpack.c.bf16 %v2220_v44, %v2220_v44 }
 0x12d   : > { %885 = vmatprep.mubr.bf16.mxu1 %v588_v45 }
 0x130   : > { %886 = vmatmul.mubr.bf16.gmra.mrb[24].mxu1 %v587_v46 }
 0x1d3   : > { %v827_v62 = vpop.f32.mrb[0].mxu1 }
 0x1d4   : > { %v828_v63 = vadd.f32 %v827_v62, %v2781_v60  ;;  %v829_v0 = vpop.f32.mrb[1].mxu1 }
 0x1d5   : > { %v830_v1 = vadd.f32 %v829_v0, %v2785_v61  ;;  %v831_v2 = vpop.f32.mrb[2].mxu1 }
 0x1d6   : > { %2221 = vtanh.f32 %v828_v63  ;;  %v832_v3 = vadd.f32 %v831_v2, %v2781_v60  ;;  %v833_v4 = vpop.f32.mrb[3].mxu1 }
 0x1d7   : > { %2223 = vtanh.f32 %v830_v1  ;;  %v834_v8 = vadd.f32 %v833_v4, %v2785_v61 }
 0x1d8   : > { %2225 = vtanh.f32 %v832_v3 }
 0x1d9   : > { %2227 = vtanh.f32 %v834_v8 }
 0x1db   : > { %v837_v7 = vpop.f32.mrb[4].mxu1 }
 0x1dc   : > { %v838_v6 = vadd.f32 %v837_v7, %v2781_v60  ;;  %v839_v9 = vpop.f32.mrb[5].mxu1 }
 0x1dd   : > { %v840_v12 = vadd.f32 %v839_v9, %v2785_v61  ;;  %v841_v13 = vpop.f32.mrb[6].mxu1 }
 0x1de   : > { %2229 = vtanh.f32 %v838_v6  ;;  %v842_v14 = vadd.f32 %v841_v13, %v2781_v60  ;;  %v843_v15 = vpop.f32.mrb[7].mxu1 }
 0x1df   : > { %2231 = vtanh.f32 %v840_v12  ;;  %v844_v16 = vadd.f32 %v843_v15, %v2785_v61 }
 0x1e0   : > { %v2222_v17 = vpop.eup %2221  ;;  %2233 = vtanh.f32 %v842_v14 }
 0x1e1   : > { %v2224_v18 = vpop.eup %2223  ;;  %2235 = vtanh.f32 %v844_v16 }
 0x1e2   : > { %v2226_v19 = vpop.eup %2225 }
 0x1e3   : > { %v2228_v20 = vpop.eup %2227  ;;  %v847_v21 = vpop.f32.mrb[8].mxu1  ;;  %v920_v22 = vpack.c.bf16 %v2226_v19, %v2222_v17 }
 0x1e4   : > { %v848_v23 = vadd.f32 %v847_v21, %v2781_v60  ;;  %v849_v24 = vpop.f32.mrb[9].mxu1  ;;  %v921_v25 = vpack.c.bf16 %v2228_v20, %v2224_v18 }
 0x1e5   : > { %v850_v26 = vadd.f32 %v849_v24, %v2785_v61  ;;  %v851_v27 = vpop.f32.mrb[10].mxu1 }
 0x1e6   : > { %2237 = vtanh.f32 %v848_v23  ;;  %v852_v28 = vadd.f32 %v851_v27, %v2781_v60  ;;  %v853_v29 = vpop.f32.mrb[11].mxu1  ;;  %1101 = vmatprep.mubr.bf16.mxu0 %v921_v25 }
 0x1e7   : > { %2239 = vtanh.f32 %v850_v26  ;;  %v854_v30 = vadd.f32 %v853_v29, %v2785_v61  ;;  %1102 = vmatmul.mubr.bf16.vlgmr.msra.gmra.mrb[28].mxu0 %v920_v22 }
 0x1e8   : > { %v2230_v31 = vpop.eup %2229  ;;  %2241 = vtanh.f32 %v852_v28 }
 0x1e9   : > { %v2232_v32 = vpop.eup %2231  ;;  %2243 = vtanh.f32 %v854_v30 }
 0x1ea   : > { %v2234_v33 = vpop.eup %2233 }
 0x1eb   : > { %v2236_v34 = vpop.eup %2235  ;;  %v857_v35 = vpop.f32.mrb[12].mxu1  ;;  %v922_v36 = vpack.c.bf16 %v2234_v33, %v2230_v31 }
 0x1ec   : > { %v858_v37 = vadd.f32 %v857_v35, %v2781_v60  ;;  %v859_v38 = vpop.f32.mrb[13].mxu1  ;;  %v923_v39 = vpack.c.bf16 %v2236_v34, %v2232_v32  ;;  %v2819_v34 = vld [vmem:[%s3428_s7] ss:$0 sm:$0xff] }
 0x1ed   : > { %v860_v40 = vadd.f32 %v859_v38, %v2785_v61  ;;  %v861_v41 = vpop.f32.mrb[14].mxu1 }
 0x1ee   : > { %2245 = vtanh.f32 %v858_v37  ;;  %v862_v42 = vadd.f32 %v861_v41, %v2781_v60  ;;  %v863_v43 = vpop.f32.mrb[15].mxu1  ;;  %1109 = vmatprep.mubr.bf16.mxu0 %v923_v39 }
 0x1ef   : > { %2247 = vtanh.f32 %v860_v40  ;;  %v864_v10 = vadd.f32 %v863_v43, %v2785_v61  ;;  %1110 = vmatmul.mubr.bf16.gmra.mrb[32].mxu0 %v922_v36 }
 0x1f0   : > { %v2238_v44 = vpop.eup %2237  ;;  %2249 = vtanh.f32 %v862_v42 }
 0x1f1   : > { %v2240_v45 = vpop.eup %2239  ;;  %2251 = vtanh.f32 %v864_v10 }
 0x1f2   : > { %v2242_v46 = vpop.eup %2241 }
 0x1f3   : > { %v2244_v11 = vpop.eup %2243  ;;  %v867_v47 = vpop.f32.mrb[16].mxu1  ;;  %v924_v48 = vpack.c.bf16 %v2242_v46, %v2238_v44 }
 0x1f4   : > { %v868_v49 = vadd.f32 %v867_v47, %v2781_v60  ;;  %v869_v50 = vpop.f32.mrb[17].mxu1  ;;  %v925_v51 = vpack.c.bf16 %v2244_v11, %v2240_v45 }
 0x1f5   : > { %v870_v52 = vadd.f32 %v869_v50, %v2785_v61  ;;  %v871_v53 = vpop.f32.mrb[18].mxu1 }
 0x1f6   : > { %2253 = vtanh.f32 %v868_v49  ;;  %v872_v54 = vadd.f32 %v871_v53, %v2781_v60  ;;  %v873_v55 = vpop.f32.mrb[19].mxu1  ;;  %1117 = vmatprep.mubr.bf16.mxu0 %v925_v51 }
 0x1f7   : > { %2255 = vtanh.f32 %v870_v52  ;;  %v874_v56 = vadd.f32 %v873_v55, %v2785_v61  ;;  %1118 = vmatmul.mubr.bf16.gmra.mrb[36].mxu0 %v924_v48 }
 0x1f8   : > { %v2246_v57 = vpop.eup %2245  ;;  %2257 = vtanh.f32 %v872_v54 }
 0x1f9   : > { %v2248_v58 = vpop.eup %2247  ;;  %2259 = vtanh.f32 %v874_v56 }
 0x1fa   : > { %v2250_v59 = vpop.eup %2249 }
 0x1fb   : > { %v2252_v62 = vpop.eup %2251  ;;  %v877_v63 = vpop.f32.mrb[20].mxu1  ;;  %v926_v0 = vpack.c.bf16 %v2250_v59, %v2246_v57 }
 0x1fc   : > { %v878_v1 = vadd.f32 %v877_v63, %v2781_v60  ;;  %v879_v2 = vpop.f32.mrb[21].mxu1  ;;  %v927_v3 = vpack.c.bf16 %v2252_v62, %v2248_v58 }
 0x1fd   : > { %v880_v4 = vadd.f32 %v879_v2, %v2785_v61  ;;  %v881_v8 = vpop.f32.mrb[22].mxu1 }
 0x1fe   : > { %2261 = vtanh.f32 %v878_v1  ;;  %v882_v7 = vadd.f32 %v881_v8, %v2781_v60  ;;  %v883_v6 = vpop.f32.mrb[23].mxu1  ;;  %1125 = vmatprep.mubr.bf16.mxu0 %v927_v3 }
 0x1ff   : > { %2263 = vtanh.f32 %v880_v4  ;;  %v884_v9 = vadd.f32 %v883_v6, %v2785_v61  ;;  %1126 = vmatmul.mubr.bf16.gmra.mrb[40].mxu0 %v926_v0 }
 0x200   : > { %v2254_v12 = vpop.eup %2253  ;;  %2265 = vtanh.f32 %v882_v7 }
 0x201   : > { %v2256_v13 = vpop.eup %2255  ;;  %2267 = vtanh.f32 %v884_v9 }
 0x202   : > { %v2258_v14 = vpop.eup %2257 }
 0x203   : > { %v2260_v15 = vpop.eup %2259  ;;  %v887_v16 = vpop.f32.mrb[24].mxu1  ;;  %v928_v17 = vpack.c.bf16 %v2258_v14, %v2254_v12 }
 0x204   : > { %v888_v18 = vadd.f32 %v887_v16, %v2781_v60  ;;  %v889_v19 = vpop.f32.mrb[25].mxu1  ;;  %v929_v20 = vpack.c.bf16 %v2260_v15, %v2256_v13 }
 0x205   : > { %v890_v21 = vadd.f32 %v889_v19, %v2785_v61  ;;  %v891_v22 = vpop.f32.mrb[26].mxu1  ;;  %v2814_v61 = vand.u32 127, %v396_v5 }
 0x206   : > { %v892_v23 = vpop.f32.mrb[27].mxu1  ;;  %1133 = vmatprep.mubr.bf16.mxu0 %v929_v20 }
 0x207   : > { %2269 = vtanh.f32 %v890_v21  ;;  %1134 = vmatmul.mubr.bf16.gmra.mrb[44].mxu0 %v928_v17  ;;  %vm1159_vm1 = vcmp.lt.s32.totalorder %v2814_v61, 4  ;;  %vm1539_vm0 = vcmp.eq.s32.totalorder %v2814_v61, 5 }
 0x208   : > { %v2262_v24 = vpop.eup %2261  ;;  %2271 = vtanh.f32 %v888_v18 }
 0x209   : > { %v2264_v25 = vpop.eup %2263 }
 0x20a   : > { %v2266_v26 = vpop.eup %2265 }
 0x20b   : > { %v2268_v27 = vpop.eup %2267  ;;  %v930_v28 = vpack.c.bf16 %v2266_v26, %v2262_v24 }
 0x20c   : > { %v931_v29 = vpack.c.bf16 %v2268_v27, %v2264_v25 }
 0x20e   : > { %1141 = vmatprep.mubr.bf16.mxu0 %v931_v29 }
 0x20f   : > { %1142 = vmatmul.mubr.bf16.gmra.mrb[48].mxu0 %v930_v28 }
 0x211   : > { %v2270_v30 = vpop.eup %2269 }
 0x212   : > { %v2272_v60 = vpop.eup %2271  ;;  %v933_v31 = vpack.c.bf16 %v2270_v30, %v2270_v30 }
 0x213   : > { %v932_v32 = vpack.c.bf16 %v2272_v60, %v2272_v60 }
 0x214   : > { %1149 = vmatprep.mubr.bf16.mxu0 %v933_v31 }
 0x217   : > { %1150 = vmatmul.mubr.bf16.gmra.mrb[52].mxu0 %v932_v32 }
 0x2ba   : > { %v1964_v33 = vpop.f32.mrb[28].mxu0 }
 0x2bb   : > { %v1965_v35 = vpop.f32.mrb[29].mxu0 }
 0x2bc   : > { %v1966_v36 = vadd.f32 %v1965_v35, %v1964_v33  ;;  %v1967_v37 = vpop.f32.mrb[30].mxu0 }
 0x2bd   : > { %v1968_v38 = vpop.f32.mrb[31].mxu0 }
 0x2be   : > { %v2823_v39 = vadd.f32 %v1966_v36, %v2819_v34  ;;  %v1969_v40 = vadd.f32 %v1968_v38, %v1967_v37 }
 0x2c0   : > { %v2826_v5 = vadd.f32 %v1969_v40, %v2819_v34  ;;  %v2831_v41 = vsel %vm1159_vm1, %v2823_v39, -1e+30 }
 0x2c1   : > { %v1174_v42 = vsel %vm1173_vm2, %v2831_v41, -inf }
 0x2c2   : > { %v1970_v43 = vpop.f32.mrb[32].mxu0  ;;  %1175 = vmax.xlane.f32.xlu0 %v1174_v42  ;;  %v2838_v10 = vsel %vm1159_vm1, %v2826_v5, -1e+30 }
 0x2c3   : > { %v1971_v44 = vpop.f32.mrb[33].mxu0  ;;  %v1177_v47 = vsel %vm1173_vm2, %v2838_v10, -inf }
 0x2c4   : > { %v1972_v45 = vadd.f32 %v1971_v44, %v1970_v43  ;;  %v1973_v46 = vpop.f32.mrb[34].mxu0 }
 0x2c5   : > { %v1974_v11 = vpop.f32.mrb[35].mxu0 }
 0x2c6   : > { %v2843_v48 = vadd.f32 %v1972_v45, %v2819_v34  ;;  %v1975_v49 = vadd.f32 %v1974_v11, %v1973_v46  ;;  %1178 = vmax.xlane.f32.xlu0 %v1177_v47 }
 0x2c8   : > { %v2846_v50 = vadd.f32 %v1975_v49, %v2819_v34  ;;  %v2851_v51 = vsel %vm1159_vm1, %v2843_v48, -1e+30 }
 0x2c9   : > { %v1180_v52 = vsel %vm1173_vm2, %v2851_v51, -inf }
 0x2ca   : > { %v1976_v53 = vpop.f32.mrb[36].mxu0  ;;  %1181 = vmax.xlane.f32.xlu1 %v1180_v52  ;;  %v2858_v54 = vsel %vm1159_vm1, %v2846_v50, -1e+30 }
 0x2cb   : > { %v1977_v55 = vpop.f32.mrb[37].mxu0  ;;  %v1183_v59 = vsel %vm1173_vm2, %v2858_v54, -inf }
 0x2cc   : > { %v1978_v56 = vadd.f32 %v1977_v55, %v1976_v53  ;;  %v1979_v57 = vpop.f32.mrb[38].mxu0 }
 0x2cd   : > { %v1980_v58 = vpop.f32.mrb[39].mxu0 }
 0x2ce   : > { %v2863_v62 = vadd.f32 %v1978_v56, %v2819_v34  ;;  %v1981_v63 = vadd.f32 %v1980_v58, %v1979_v57  ;;  %1184 = vmax.xlane.f32.xlu1 %v1183_v59  ;;  %v1366_v57 = vld [vmem:[%s2765_s25 + $0x50] sm:$0xff]  ;;  %v1365_v58 = vld [vmem:[%s2765_s25 + $0x48] sm:$0xff]  ;;  %v2954_v59 = vpop.permute.xlu1 %1373 }
 0x2cf   : > { %vm1409_vm4 = vcmp.eq.s32.totalorder %v2814_v61, %v2954_v59 }
 0x2d0   : > { %v2866_v0 = vadd.f32 %v1981_v63, %v2819_v34  ;;  %v2871_v1 = vsel %vm1159_vm1, %v2863_v62, -1e+30 }
 0x2d1   : > { %v1186_v2 = vsel %vm1173_vm2, %v2871_v1, -inf }
 0x2d2   : > { %v1982_v3 = vpop.f32.mrb[40].mxu0  ;;  %1187 = vmax.xlane.f32.xlu0 %v1186_v2  ;;  %v2878_v4 = vsel %vm1159_vm1, %v2866_v0, -1e+30  ;;  %v2956_v63 = vpop.permute.xlu1 %1376 }
 0x2d3   : > { %v1983_v8 = vpop.f32.mrb[41].mxu0  ;;  %v1189_v7 = vsel %vm1173_vm2, %v2878_v4, -inf  ;;  %vm1410_vm5 = vcmp.eq.s32.totalorder %v2814_v61, %v2956_v63 }
 0x2d4   : > { %v1984_v6 = vadd.f32 %v1983_v8, %v1982_v3  ;;  %v1985_v9 = vpop.f32.mrb[42].mxu0  ;;  %1190 = vmax.xlane.f32.xlu1 %v1189_v7  ;;  %v2966_v7 = vpop.permute.xlu0 %1370 }
 0x2d5   : > { %v1986_v12 = vpop.f32.mrb[43].mxu0  ;;  %vm1408_vm3 = vcmp.eq.s32.totalorder %v2814_v61, %v2966_v7 }
 0x2d6   : > { %v2883_v13 = vadd.f32 %v1984_v6, %v2819_v34  ;;  %v1987_v14 = vadd.f32 %v1986_v12, %v1985_v9  ;;  %v2958_v2 = vpop.permute.xlu1 %1379 }
 0x2d7   : > { %vm1411_vm6 = vcmp.eq.s32.totalorder %v2814_v61, %v2958_v2 }
 0x2d8   : > { %v2886_v15 = vadd.f32 %v1987_v14, %v2819_v34  ;;  %v2891_v16 = vsel %vm1159_vm1, %v2883_v13, -1e+30 }
 0x2d9   : > { %v1192_v17 = vsel %vm1173_vm2, %v2891_v16, -inf }
 0x2da   : > { %v1988_v18 = vpop.f32.mrb[44].mxu0  ;;  %1193 = vmax.xlane.f32.xlu0 %v1192_v17  ;;  %v2898_v19 = vsel %vm1159_vm1, %v2886_v15, -1e+30 }
 0x2db   : > { %v1989_v20 = vpop.f32.mrb[45].mxu0  ;;  %v1195_v21 = vsel %vm1173_vm2, %v2898_v19, -inf }
 0x2dc   : > { %v1990_v22 = vadd.f32 %v1989_v20, %v1988_v18  ;;  %v1991_v23 = vpop.f32.mrb[46].mxu0  ;;  %1196 = vmax.xlane.f32.xlu1 %v1195_v21 }
 0x2dd   : > { %v1992_v24 = vpop.f32.mrb[47].mxu0 }
 0x2de   : > { %v2903_v25 = vadd.f32 %v1990_v22, %v2819_v34  ;;  %v1993_v26 = vadd.f32 %v1992_v24, %v1991_v23 }
 0x2e0   : > { %v2906_v27 = vadd.f32 %v1993_v26, %v2819_v34  ;;  %v2911_v28 = vsel %vm1159_vm1, %v2903_v25, -1e+30 }
 0x2e1   : > { %v1198_v29 = vsel %vm1173_vm2, %v2911_v28, -inf }
 0x2e2   : > { %v1994_v30 = vpop.f32.mrb[48].mxu0  ;;  %1199 = vmax.xlane.f32.xlu0 %v1198_v29  ;;  %v2918_v60 = vsel %vm1159_vm1, %v2906_v27, -1e+30 }
 0x2e3   : > { %v1995_v31 = vpop.f32.mrb[49].mxu0  ;;  %v1201_v32 = vsel %vm1173_vm2, %v2918_v60, -inf }
 0x2e4   : > { %v1996_v33 = vadd.f32 %v1995_v31, %v1994_v30  ;;  %v1997_v35 = vpop.f32.mrb[50].mxu0  ;;  %1202 = vmax.xlane.f32.xlu1 %v1201_v32 }
 0x2e5   : > { %v1998_v36 = vpop.f32.mrb[51].mxu0 }
 0x2e6   : > { %v2923_v37 = vadd.f32 %v1996_v33, %v2819_v34  ;;  %v1999_v38 = vadd.f32 %v1998_v36, %v1997_v35 }
 0x2e8   : > { %v2926_v40 = vadd.f32 %v1999_v38, %v2819_v34  ;;  %v2931_v42 = vsel %vm1159_vm1, %v2923_v37, -1e+30 }
 0x2e9   : > { %v1204_v43 = vsel %vm1173_vm2, %v2931_v42, -inf }
 0x2ea   : > { %v2000_v44 = vpop.f32.mrb[52].mxu0  ;;  %1205 = vmax.xlane.f32.xlu0 %v1204_v43  ;;  %v2938_v45 = vsel %vm1159_vm1, %v2926_v40, -1e+30 }
 0x2eb   : > { %v2001_v46 = vpop.f32.mrb[53].mxu0  ;;  %v1207_v11 = vsel %vm1173_vm2, %v2938_v45, -inf }
 0x2ec   : > { %v2002_v47 = vadd.f32 %v2001_v46, %v2000_v44  ;;  %v2003_v49 = vpop.f32.mrb[54].mxu0  ;;  %1208 = vmax.xlane.f32.xlu1 %v1207_v11 }
 0x2ed   : > { %v2004_v52 = vpop.f32.mrb[55].mxu0 }
 0x2ee   : > { %v2943_v53 = vadd.f32 %v2002_v47, %v2819_v34  ;;  %v2960_v34 = vpop.permute.xlu1 %1382 }
 0x2ef   : > { %vm1412_vm7 = vcmp.eq.s32.totalorder %v2814_v61, %v2960_v34 }
 0x2f0   : > { %v2948_v55 = vsel %vm1159_vm1, %v2943_v53, -1e+30 }
 0x2f1   : > { %v1210_v56 = vsel %vm1173_vm2, %v2948_v55, -inf }
 0x2f2   : > { %1211 = vmax.xlane.f32.xlu0 %v1210_v56  ;;  %v2962_v3 = vpop.permute.xlu1 %1385 }
 0x2f3   : > { %vm1413_vm8 = vcmp.eq.s32.totalorder %v2814_v61, %v2962_v3 }
 0x2f6   : > { %v2964_v8 = vpop.permute.xlu1 %1388 }
 0x2f7   : > { %vm1414_vm9 = vcmp.eq.s32.totalorder %v2814_v61, %v2964_v8 }
 0x2fa   : > { %v2968_v6 = vpop.permute.xlu1 %1391 }
 0x2fb   : > { %vm1415_vm10 = vcmp.eq.s32.totalorder %v2814_v61, %v2968_v6 }
 0x2fd   : > { %1400 = vperm.xlu1 %2098, %v1366_v57  }
 0x2fe   : > { %v2974_v17 = vpop.permute.xlu1 %1394 }
 0x2ff   : > { %vm1416_vm11 = vcmp.eq.s32.totalorder %v2814_v61, %v2974_v17 }
 0x308   : > { %1397 = vperm.xlu0 %2097, %v1365_v58  }
 0x34f   : > { %v1176_v9 = vpop.xlane.xlu0 %1175 }
 0x350   : > { %v2971_v12 = vsub.f32 %v2831_v41, %v1176_v9 }
 0x352   : > { %v1226_v14 = vmul.f32 1.442695, %v2971_v12 }
 0x353   : > { %v1179_v18 = vpop.xlane.xlu0 %1178 }
 0x354   : > { %2273 = vpow2.f32 %v1226_v14  ;;  %v2977_v20 = vsub.f32 %v2838_v10, %v1179_v18 }
 0x356   : > { %v1228_v21 = vmul.f32 1.442695, %v2977_v20 }
 0x357   : > { %v1182_v22 = vpop.xlane.xlu1 %1181 }
 0x358   : > { %2275 = vpow2.f32 %v1228_v21  ;;  %v2981_v23 = vsub.f32 %v2851_v51, %v1182_v22 }
 0x35a   : > { %v1230_v24 = vmul.f32 1.442695, %v2981_v23 }
 0x35b   : > { %v1185_v41 = vpop.xlane.xlu1 %1184 }
 0x35c   : > { %2277 = vpow2.f32 %v1230_v24  ;;  %v2985_v26 = vsub.f32 %v2858_v54, %v1185_v41 }
 0x35e   : > { %v2987_v29 = vpop.eup %2273  ;;  %v1232_v30 = vmul.f32 1.442695, %v2985_v26 }
 0x35f   : > { %v1188_v10 = vpop.xlane.xlu0 %1187  ;;  %v1252_v31 = vsel %vm1173_vm2, %v2987_v29, 0.0 }
 0x360   : > { %2279 = vpow2.f32 %v1232_v30  ;;  %v2993_v32 = vsub.f32 %v2871_v1, %v1188_v10  ;;  %1253 = vadd.xlane.f32.xlu1 %v1252_v31 }
 0x361   : > { %v1191_v51 = vpop.xlane.xlu1 %1190 }
 0x362   : > { %v2995_v33 = vpop.eup %2275  ;;  %v1234_v35 = vmul.f32 1.442695, %v2993_v32  ;;  %v2999_v54 = vsub.f32 %v2878_v4, %v1191_v51 }
 0x363   : > { %v1255_v36 = vsel %vm1173_vm2, %v2995_v33, 0.0 }
 0x364   : > { %2281 = vpow2.f32 %v1234_v35  ;;  %v1236_v38 = vmul.f32 1.442695, %v2999_v54  ;;  %1256 = vadd.xlane.f32.xlu0 %v1255_v36 }
 0x366   : > { %v3004_v43 = vpop.eup %2277  ;;  %2283 = vpow2.f32 %v1236_v38 }
 0x367   : > { %v1194_v1 = vpop.xlane.xlu0 %1193  ;;  %v1258_v44 = vsel %vm1173_vm2, %v3004_v43, 0.0 }
 0x368   : > { %v3009_v46 = vsub.f32 %v2891_v16, %v1194_v1  ;;  %1259 = vadd.xlane.f32.xlu1 %v1258_v44 }
 0x369   : > { %v1197_v4 = vpop.xlane.xlu1 %1196 }
 0x36a   : > { %v3011_v11 = vpop.eup %2279  ;;  %v1238_v47 = vmul.f32 1.442695, %v3009_v46  ;;  %v3015_v49 = vsub.f32 %v2898_v19, %v1197_v4 }
 0x36b   : > { %v1261_v52 = vsel %vm1173_vm2, %v3011_v11, 0.0 }
 0x36c   : > { %2285 = vpow2.f32 %v1238_v47  ;;  %v1240_v56 = vmul.f32 1.442695, %v3015_v49  ;;  %1262 = vadd.xlane.f32.xlu0 %v1261_v52 }
 0x36e   : > { %v3020_v57 = vpop.eup %2281  ;;  %2287 = vpow2.f32 %v1240_v56 }
 0x36f   : > { %v1200_v16 = vpop.xlane.xlu0 %1199  ;;  %v1264_v58 = vsel %vm1173_vm2, %v3020_v57, 0.0 }
 0x370   : > { %v3024_v9 = vpop.eup %2283  ;;  %v3027_v14 = vsub.f32 %v2911_v28, %v1200_v16  ;;  %1265 = vadd.xlane.f32.xlu1 %v1264_v58 }
 0x371   : > { %v1203_v19 = vpop.xlane.xlu1 %1202  ;;  %v1267_v18 = vsel %vm1173_vm2, %v3024_v9, 0.0 }
 0x372   : > { %v1242_v21 = vmul.f32 1.442695, %v3027_v14  ;;  %v3033_v22 = vsub.f32 %v2918_v60, %v1203_v19  ;;  %1268 = vadd.xlane.f32.xlu0 %v1267_v18 }
 0x374   : > { %2289 = vpow2.f32 %v1242_v21  ;;  %v1244_v24 = vmul.f32 1.442695, %v3033_v22  ;;  %v1367_v21 = vld [vmem:[%s2765_s25 + $0x58] sm:$0xff] }
 0x376   : > { %v3036_v41 = vpop.eup %2285  ;;  %2291 = vpow2.f32 %v1244_v24  ;;  %v1368_v24 = vld [vmem:[%s2765_s25 + $0x60] sm:$0xff] }
 0x377   : > { %v1206_v30 = vpop.xlane.xlu0 %1205  ;;  %v1270_v28 = vsel %vm1173_vm2, %v3036_v41, 0.0 }
 0x378   : > { %v3040_v10 = vpop.eup %2287  ;;  %v3043_v31 = vsub.f32 %v2931_v42, %v1206_v30  ;;  %1271 = vadd.xlane.f32.xlu1 %v1270_v28 }
 0x379   : > { %v1209_v51 = vpop.xlane.xlu1 %1208  ;;  %v1273_v60 = vsel %vm1173_vm2, %v3040_v10, 0.0 }
 0x37a   : > { %v1246_v35 = vmul.f32 1.442695, %v3043_v31  ;;  %v3049_v36 = vsub.f32 %v2938_v45, %v1209_v51  ;;  %1274 = vadd.xlane.f32.xlu0 %v1273_v60 }
 0x37c   : > { %2293 = vpow2.f32 %v1246_v35  ;;  %v1248_v38 = vmul.f32 1.442695, %v3049_v36 }
 0x37d   : > { %v3078_v30 = vpop.permute.xlu1 %1400 }
 0x37e   : > { %v3052_v1 = vpop.eup %2289  ;;  %2295 = vpow2.f32 %v1248_v38  ;;  %vm1418_vm13 = vcmp.eq.s32.totalorder %v2814_v61, %v3078_v30 }
 0x37f   : > { %v1212_v44 = vpop.xlane.xlu0 %1211  ;;  %v1276_v42 = vsel %vm1173_vm2, %v3052_v1, 0.0 }
 0x380   : > { %v3056_v4 = vpop.eup %2291  ;;  %v3059_v47 = vsub.f32 %v2948_v55, %v1212_v44  ;;  %1277 = vadd.xlane.f32.xlu1 %v1276_v42 }
 0x381   : > { %v1279_v45 = vsel %vm1173_vm2, %v3056_v4, 0.0 }
 0x382   : > { %v1250_v52 = vmul.f32 1.442695, %v3059_v47  ;;  %1280 = vadd.xlane.f32.xlu0 %v1279_v45 }
 0x384   : > { %2297 = vpow2.f32 %v1250_v52 }
 0x386   : > { %v3064_v56 = vpop.eup %2293 }
 0x387   : > { %v1282_v16 = vsel %vm1173_vm2, %v3064_v56, 0.0  ;;  %v3080_v28 = vpop.permute.xlu0 %1397 }
 0x388   : > { %v3068_v58 = vpop.eup %2295  ;;  %1283 = vadd.xlane.f32.xlu1 %v1282_v16  ;;  %vm1417_vm12 = vcmp.eq.s32.totalorder %v2814_v61, %v3080_v28 }
 0x389   : > { %v1285_v55 = vsel %vm1173_vm2, %v3068_v58, 0.0 }
 0x38a   : > { %1286 = vadd.xlane.f32.xlu0 %v1285_v55 }
 0x38e   : > { %v3072_v19 = vpop.eup %2297 }
 0x38f   : > { %v1288_v18 = vsel %vm1173_vm2, %v3072_v19, 0.0 }
 0x390   : > { %1289 = vadd.xlane.f32.xlu1 %v1288_v18 }
 0x3a0   : > { %1403 = vperm.xlu0 %2097, %v1367_v21  }
 0x3a1   : > { %1406 = vperm.xlu1 %2098, %v1368_v24  }
 0x3ed   : > { %v1254_v51 = vpop.xlane.xlu1 %1253 }
 0x3ee   : > { %2299 = vlog2.f32 %v1254_v51 }
 0x3ef   : > { %2301 = vrcp.f32 %v1254_v51 }
 0x3f1   : > { %v1257_v60 = vpop.xlane.xlu0 %1256 }
 0x3f2   : > { %2303 = vlog2.f32 %v1257_v60 }
 0x3f3   : > { %2305 = vrcp.f32 %v1257_v60 }
 0x3f5   : > { %v1260_v35 = vpop.xlane.xlu1 %1259 }
 0x3f6   : > { %2307 = vlog2.f32 %v1260_v35 }
 0x3f7   : > { %2309 = vrcp.f32 %v1260_v35 }
 0x3f8   : > { %v2300_v38 = vpop.eup %2299 }
 0x3f9   : > { %v2302_v44 = vpop.eup %2301  ;;  %v1292_v42 = vmul.f32 0.6931472, %v2300_v38  ;;  %v1263_v45 = vpop.xlane.xlu0 %1262 }
 0x3fa   : > { %2311 = vlog2.f32 %v1263_v45  ;;  %v3086_v55 = vmul.f32 %v2302_v44, %v2987_v29 }
 0x3fb   : > { %2313 = vrcp.f32 %v1263_v45  ;;  %v1317_v52 = vsub.f32 %v2971_v12, %v1292_v42 }
 0x3fc   : > { %v2304_v16 = vpop.eup %2303 }
 0x3fd   : > { %v2306_v18 = vpop.eup %2305  ;;  %v1294_v21 = vmul.f32 0.6931472, %v2304_v16  ;;  %v1266_v24 = vpop.xlane.xlu1 %1265  ;;  %v1421_v51 = vsel %vm1408_vm3, %v1317_v52, 0.0  ;;  %v1473_v35 = vmul.f32 %v3086_v55, %v1317_v52  ;;  %vm1538_vm3 = vcmp.eq.s32.totalorder %v2814_v61, 4 }
 0x3fe   : > { %2315 = vlog2.f32 %v1266_v24  ;;  %v1434_v60 = vsel %vm1173_vm2, %v1421_v51, 0.0  ;;  %v3094_v7 = vmul.f32 %v2306_v18, %v2995_v33 }
 0x3ff   : > { %2317 = vrcp.f32 %v1266_v24  ;;  %1435 = vadd.xlane.f32.xlu0 %v1434_v60  ;;  %v1269_v38 = vpop.xlane.xlu0 %1268  ;;  %v1318_v12 = vsub.f32 %v2977_v20, %v1294_v21  ;;  %v1486_v16 = vsel %vm1173_vm2, %v1473_v35, 0.0 }
 0x400   : > { %v2308_v42 = vpop.eup %2307  ;;  %2319 = vlog2.f32 %v1269_v38 }
 0x401   : > { %v2310_v29 = vpop.eup %2309  ;;  %v1296_v44 = vmul.f32 0.6931472, %v2308_v42  ;;  %v1422_v45 = vsel %vm1409_vm4, %v1318_v12, 0.0  ;;  %v1474_v24 = vmul.f32 %v3094_v7, %v1318_v12  ;;  %2321 = vrcp.f32 %v1269_v38 }
 0x402   : > { %v1437_v52 = vsel %vm1173_vm2, %v1422_v45, 0.0  ;;  %v3103_v59 = vmul.f32 %v2310_v29, %v3004_v43 }
 0x403   : > { %1487 = vadd.xlane.f32.xlu0 %v1486_v16  ;;  %1438 = vadd.xlane.f32.xlu1 %v1437_v52  ;;  %v1319_v20 = vsub.f32 %v2981_v23, %v1296_v44  ;;  %v1489_v38 = vsel %vm1173_vm2, %v1474_v24, 0.0 }
 0x404   : > { %v2312_v21 = vpop.eup %2311 }
 0x405   : > { %v2314_v33 = vpop.eup %2313  ;;  %v1298_v18 = vmul.f32 0.6931472, %v2312_v21  ;;  %v1272_v51 = vpop.xlane.xlu1 %1271  ;;  %v1423_v60 = vsel %vm1410_vm5, %v1319_v20, 0.0  ;;  %v1475_v12 = vmul.f32 %v3103_v59, %v1319_v20 }
 0x406   : > { %2323 = vlog2.f32 %v1272_v51  ;;  %v1440_v35 = vsel %vm1173_vm2, %v1423_v60, 0.0  ;;  %v3112_v43 = vmul.f32 %v2314_v33, %v3011_v11 }
 0x407   : > { %2325 = vrcp.f32 %v1272_v51  ;;  %1441 = vadd.xlane.f32.xlu0 %v1440_v35  ;;  %1490 = vadd.xlane.f32.xlu1 %v1489_v38  ;;  %v1275_v23 = vpop.xlane.xlu0 %1274  ;;  %v1320_v63 = vsub.f32 %v2985_v26, %v1298_v18  ;;  %v1492_v52 = vsel %vm1173_vm2, %v1475_v12, 0.0 }
 0x408   : > { %v2316_v42 = vpop.eup %2315  ;;  %2327 = vlog2.f32 %v1275_v23 }
 0x409   : > { %v2318_v29 = vpop.eup %2317  ;;  %v1300_v44 = vmul.f32 0.6931472, %v2316_v42  ;;  %v1424_v45 = vsel %vm1411_vm6, %v1320_v63, 0.0  ;;  %v1476_v20 = vmul.f32 %v3112_v43, %v1320_v63  ;;  %2329 = vrcp.f32 %v1275_v23 }
 0x40a   : > { %v2320_v16 = vpop.eup %2319  ;;  %v1443_v24 = vsel %vm1173_vm2, %v1424_v45, 0.0  ;;  %v3119_v26 = vmul.f32 %v2318_v29, %v3020_v57 }
 0x40b   : > { %v1302_v21 = vmul.f32 0.6931472, %v2320_v16  ;;  %1493 = vadd.xlane.f32.xlu0 %v1492_v52  ;;  %1444 = vadd.xlane.f32.xlu1 %v1443_v24  ;;  %v1321_v2 = vsub.f32 %v2993_v32, %v1300_v44  ;;  %v2322_v11 = vpop.eup %2321  ;;  %v1495_v60 = vsel %vm1173_vm2, %v1476_v20, 0.0 }
 0x40d   : > { %v1278_v33 = vpop.xlane.xlu1 %1277  ;;  %v1477_v18 = vmul.f32 %v3119_v26, %v1321_v2  ;;  %v1322_v51 = vsub.f32 %v2999_v54, %v1302_v21  ;;  %v1425_v35 = vsel %vm1412_vm7, %v1321_v2, 0.0  ;;  %v3130_v54 = vmul.f32 %v2322_v11, %v3024_v9 }
 0x40e   : > { %2331 = vlog2.f32 %v1278_v33  ;;  %v1446_v3 = vsel %vm1173_vm2, %v1425_v35, 0.0 }
 0x40f   : > { %2333 = vrcp.f32 %v1278_v33  ;;  %1496 = vadd.xlane.f32.xlu0 %v1495_v60  ;;  %v1281_v32 = vpop.xlane.xlu0 %1280  ;;  %v1498_v57 = vsel %vm1173_vm2, %v1477_v18, 0.0  ;;  %v1426_v38 = vsel %vm1413_vm8, %v1322_v51, 0.0  ;;  %v1478_v29 = vmul.f32 %v3130_v54, %v1322_v51 }
 0x410   : > { %v2324_v12 = vpop.eup %2323  ;;  %2335 = vlog2.f32 %v1281_v32  ;;  %1499 = vadd.xlane.f32.xlu1 %v1498_v57  ;;  %v1449_v42 = vsel %vm1173_vm2, %v1426_v38, 0.0 }
 0x411   : > { %v2326_v34 = vpop.eup %2325  ;;  %v1304_v23 = vmul.f32 0.6931472, %v2324_v12  ;;  %2337 = vrcp.f32 %v1281_v32  ;;  %v1501_v21 = vsel %vm1173_vm2, %v1478_v29, 0.0 }
 0x412   : > { %v2328_v63 = vpop.eup %2327  ;;  %v3137_v16 = vmul.f32 %v2326_v34, %v3036_v41 }
 0x413   : > { %v1306_v44 = vmul.f32 0.6931472, %v2328_v63  ;;  %1447 = vadd.xlane.f32.xlu0 %v1446_v3  ;;  %v1323_v45 = vsub.f32 %v3009_v46, %v1304_v23  ;;  %v2330_v9 = vpop.eup %2329 }
 0x414   : > { %1450 = vadd.xlane.f32.xlu1 %v1449_v42 }
 0x415   : > { %v1284_v52 = vpop.xlane.xlu1 %1283  ;;  %v1479_v24 = vmul.f32 %v3137_v16, %v1323_v45  ;;  %v1324_v20 = vsub.f32 %v3015_v49, %v1306_v44  ;;  %v1427_v2 = vsel %vm1414_vm9, %v1323_v45, 0.0  ;;  %v3148_v49 = vmul.f32 %v2330_v9, %v3040_v10 }
 0x416   : > { %2339 = vlog2.f32 %v1284_v52  ;;  %v1452_v6 = vsel %vm1173_vm2, %v1427_v2, 0.0 }
 0x417   : > { %2341 = vrcp.f32 %v1284_v52  ;;  %1502 = vadd.xlane.f32.xlu0 %v1501_v21  ;;  %v1287_v46 = vpop.xlane.xlu0 %1286  ;;  %v1504_v41 = vsel %vm1173_vm2, %v1479_v24, 0.0  ;;  %v1428_v11 = vsel %vm1415_vm10, %v1324_v20, 0.0  ;;  %v1480_v32 = vmul.f32 %v3148_v49, %v1324_v20 }
 0x418   : > { %v2332_v33 = vpop.eup %2331  ;;  %2343 = vlog2.f32 %v1287_v46  ;;  %1505 = vadd.xlane.f32.xlu1 %v1504_v41  ;;  %v1455_v60 = vsel %vm1173_vm2, %v1428_v11, 0.0 }
 0x419   : > { %v2334_v8 = vpop.eup %2333  ;;  %v1308_v18 = vmul.f32 0.6931472, %v2332_v33  ;;  %2345 = vrcp.f32 %v1287_v46  ;;  %v1507_v63 = vsel %vm1173_vm2, %v1480_v32, 0.0 }
 0x41a   : > { %v2336_v51 = vpop.eup %2335  ;;  %v3155_v38 = vmul.f32 %v2334_v8, %v3052_v1 }
 0x41b   : > { %v1310_v57 = vmul.f32 0.6931472, %v2336_v51  ;;  %1453 = vadd.xlane.f32.xlu0 %v1452_v6  ;;  %v1325_v35 = vsub.f32 %v3027_v14, %v1308_v18  ;;  %v2338_v10 = vpop.eup %2337 }
 0x41c   : > { %1456 = vadd.xlane.f32.xlu1 %v1455_v60  ;;  %v3166_v29 = vmul.f32 %v2338_v10, %v3056_v4 }
 0x41d   : > { %v1290_v12 = vpop.xlane.xlu1 %1289  ;;  %v1481_v34 = vmul.f32 %v3155_v38, %v1325_v35  ;;  %v1326_v23 = vsub.f32 %v3033_v22, %v1310_v57  ;;  %v1429_v1 = vsel %vm1416_vm11, %v1325_v35, 0.0 }
 0x41e   : > { %2347 = vlog2.f32 %v1290_v12  ;;  %v1458_v45 = vsel %vm1173_vm2, %v1429_v1, 0.0 }
 0x41f   : > { %2349 = vrcp.f32 %v1290_v12  ;;  %1508 = vadd.xlane.f32.xlu0 %v1507_v63  ;;  %v1510_v14 = vsel %vm1173_vm2, %v1481_v34, 0.0  ;;  %v1430_v42 = vsel %vm1417_vm12, %v1326_v23, 0.0  ;;  %v1482_v9 = vmul.f32 %v3166_v29, %v1326_v23  ;;  %v1404_v60 = vpop.permute.xlu0 %1403 }
 0x420   : > { %v2340_v3 = vpop.eup %2339  ;;  %1511 = vadd.xlane.f32.xlu1 %v1510_v14  ;;  %v1461_v28 = vsel %vm1173_vm2, %v1430_v42, 0.0  ;;  %vm1419_vm15 = vcmp.eq.s32.totalorder %v2814_v61, %v1404_v60 }
 0x421   : > { %v2342_v22 = vpop.eup %2341  ;;  %v1312_v44 = vmul.f32 0.6931472, %v2340_v3  ;;  %v1513_v46 = vsel %vm1173_vm2, %v1482_v9, 0.0  ;;  %v1407_v30 = vpop.permute.xlu1 %1406 }
 0x422   : > { %v2344_v17 = vpop.eup %2343  ;;  %v3173_v20 = vmul.f32 %v2342_v22, %v3064_v56  ;;  %vm1420_vm14 = vcmp.eq.s32.totalorder %v2814_v61, %v1407_v30 }
 0x423   : > { %v1314_v52 = vmul.f32 0.6931472, %v2344_v17  ;;  %1459 = vadd.xlane.f32.xlu0 %v1458_v45  ;;  %v1327_v24 = vsub.f32 %v3043_v31, %v1312_v44  ;;  %v2346_v21 = vpop.eup %2345 }
 0x424   : > { %1462 = vadd.xlane.f32.xlu1 %v1461_v28  ;;  %v3182_v31 = vmul.f32 %v2346_v21, %v3068_v58 }
 0x425   : > { %v1483_v4 = vmul.f32 %v3173_v20, %v1327_v24  ;;  %v1328_v41 = vsub.f32 %v3049_v36, %v1314_v52  ;;  %v1431_v11 = vsel %vm1418_vm13, %v1327_v24, 0.0 }
 0x426   : > { %v1464_v18 = vsel %vm1173_vm2, %v1431_v11, 0.0 }
 0x427   : > { %1514 = vadd.xlane.f32.xlu0 %v1513_v46  ;;  %v1516_v2 = vsel %vm1173_vm2, %v1483_v4, 0.0  ;;  %v1484_v51 = vmul.f32 %v3182_v31, %v1328_v41  ;;  %v1432_v10 = vsel %vm1419_vm15, %v1328_v41, 0.0 }
 0x428   : > { %v2348_v33 = vpop.eup %2347  ;;  %1517 = vadd.xlane.f32.xlu1 %v1516_v2 }
 0x429   : > { %v2350_v56 = vpop.eup %2349  ;;  %v1316_v8 = vmul.f32 0.6931472, %v2348_v33  ;;  %v1519_v58 = vsel %vm1173_vm2, %v1484_v51, 0.0 }
 0x42a   : > { %v3188_v36 = vmul.f32 %v2350_v56, %v3072_v19  ;;  %v1467_v19 = vsel %vm1173_vm2, %v1432_v10, 0.0 }
 0x42b   : > { %1465 = vadd.xlane.f32.xlu0 %v1464_v18  ;;  %v1329_v6 = vsub.f32 %v3059_v47, %v1316_v8 }
 0x42d   : > { %v1485_v32 = vmul.f32 %v3188_v36, %v1329_v6  ;;  %v1433_v35 = vsel %vm1420_vm14, %v1329_v6, 0.0 }
 0x42e   : > { %v1470_v47 = vsel %vm1173_vm2, %v1433_v35, 0.0 }
 0x42f   : > { %1520 = vadd.xlane.f32.xlu0 %v1519_v58  ;;  %v1522_v57 = vsel %vm1173_vm2, %v1485_v32, 0.0 }
 0x430   : > { %1523 = vadd.xlane.f32.xlu1 %v1522_v57 }
 0x433   : > { %1471 = vadd.xlane.f32.xlu0 %v1470_v47 }
 0x434   : > { %1468 = vadd.xlane.f32.xlu1 %v1467_v19 }
 0x48c   : > { %v1436_v12 = vpop.xlane.xlu0 %1435 }
 0x490   : > { %v1439_v34 = vpop.xlane.xlu1 %1438  ;;  %v1488_v23 = vpop.xlane.xlu0 %1487 }
 0x491   : > { %v1525_v63 = vsub.f32 0.0, %v1488_v23 }
 0x493   : > { %v1540_v14 = vsel %vm1539_vm0, %v1436_v12, %v1525_v63 }
 0x494   : > { %v1553_v1 = vsel %vm1538_vm3, %v2823_v39, %v1540_v14  ;;  %v1491_v3 = vpop.xlane.xlu1 %1490  ;;  %v1442_v42 = vpop.xlane.xlu0 %1441 }
 0x495   : > { %v1566_v22 = vsel %vm1159_vm1, %v3086_v55, %v1553_v1  ;;  %v1526_v44 = vsub.f32 0.0, %v1491_v3 }
 0x496   : > { %1579 = vst.msk [vmem:[%s3208_s27] sm:$0xff] %vm1173_vm2, %v1566_v22 }
 0x497   : > { %v1541_v17 = vsel %vm1539_vm0, %v1439_v34, %v1526_v44 }
 0x498   : > { %v1554_v39 = vsel %vm1538_vm3, %v2826_v5, %v1541_v17  ;;  %v1445_v45 = vpop.xlane.xlu1 %1444  ;;  %v1494_v9 = vpop.xlane.xlu0 %1493 }
 0x499   : > { %v1567_v55 = vsel %vm1159_vm1, %v3094_v7, %v1554_v39  ;;  %v1527_v52 = vsub.f32 0.0, %v1494_v9 }
 0x49a   : > { %1580 = vst.msk [vmem:[%s3208_s27 + $0x8] sm:$0xff] %vm1173_vm2, %v1567_v55 }
 0x49b   : > { %v1542_v28 = vsel %vm1539_vm0, %v1442_v42, %v1527_v52 }
 0x49c   : > { %v1555_v24 = vsel %vm1538_vm3, %v2843_v48, %v1542_v28  ;;  %v1497_v21 = vpop.xlane.xlu0 %1496 }
 0x49d   : > { %v1568_v5 = vsel %vm1159_vm1, %v3103_v59, %v1555_v24  ;;  %v1528_v4 = vsub.f32 0.0, %v1497_v21  ;;  %v1500_v46 = vpop.xlane.xlu1 %1499 }
 0x49e   : > { %1581 = vst.msk [vmem:[%s3208_s27 + $0x10] sm:$0xff] %vm1173_vm2, %v1568_v5  ;;  %v1529_v7 = vsub.f32 0.0, %v1500_v46 }
 0x49f   : > { %v1543_v41 = vsel %vm1539_vm0, %v1445_v45, %v1528_v4 }
 0x4a0   : > { %v1556_v2 = vsel %vm1538_vm3, %v2846_v50, %v1543_v41  ;;  %v1448_v11 = vpop.xlane.xlu0 %1447 }
 0x4a1   : > { %v1569_v48 = vsel %vm1159_vm1, %v3112_v43, %v1556_v2  ;;  %v1544_v59 = vsel %vm1539_vm0, %v1448_v11, %v1529_v7  ;;  %v1451_v33 = vpop.xlane.xlu1 %1450 }
 0x4a2   : > { %1582 = vst.msk [vmem:[%s3208_s27 + $0x18] sm:$0xff] %vm1173_vm2, %v1569_v48  ;;  %v1557_v56 = vsel %vm1538_vm3, %v2863_v62, %v1544_v59 }
 0x4a3   : > { %v1570_v50 = vsel %vm1159_vm1, %v3119_v26, %v1557_v56 }
 0x4a4   : > { %1583 = vst.msk [vmem:[%s3208_s27 + $0x20] sm:$0xff] %vm1173_vm2, %v1570_v50  ;;  %v1503_v8 = vpop.xlane.xlu0 %1502 }
 0x4a5   : > { %v1530_v43 = vsub.f32 0.0, %v1503_v8  ;;  %v1506_v18 = vpop.xlane.xlu1 %1505 }
 0x4a6   : > { %v1531_v51 = vsub.f32 0.0, %v1506_v18 }
 0x4a7   : > { %v1545_v30 = vsel %vm1539_vm0, %v1451_v33, %v1530_v43 }
 0x4a8   : > { %v1558_v6 = vsel %vm1538_vm3, %v2866_v0, %v1545_v30  ;;  %v1454_v60 = vpop.xlane.xlu0 %1453 }
 0x4a9   : > { %v1571_v62 = vsel %vm1159_vm1, %v3130_v54, %v1558_v6  ;;  %v1546_v26 = vsel %vm1539_vm0, %v1454_v60, %v1531_v51  ;;  %v1457_v32 = vpop.xlane.xlu1 %1456 }
 0x4aa   : > { %1584 = vst.msk [vmem:[%s3208_s27 + $0x28] sm:$0xff] %vm1173_vm2, %v1571_v62  ;;  %v1559_v58 = vsel %vm1538_vm3, %v2883_v13, %v1546_v26 }
 0x4ab   : > { %v1572_v0 = vsel %vm1159_vm1, %v3137_v16, %v1559_v58 }
 0x4ac   : > { %1585 = vst.msk [vmem:[%s3208_s27 + $0x30] sm:$0xff] %vm1173_vm2, %v1572_v0  ;;  %v1509_v57 = vpop.xlane.xlu0 %1508 }
 0x4ad   : > { %v1532_v54 = vsub.f32 0.0, %v1509_v57  ;;  %v1512_v35 = vpop.xlane.xlu1 %1511 }
 0x4ae   : > { %v1533_v10 = vsub.f32 0.0, %v1512_v35 }
 0x4af   : > { %v1547_v47 = vsel %vm1539_vm0, %v1457_v32, %v1532_v54 }
 0x4b0   : > { %v1560_v19 = vsel %vm1538_vm3, %v2886_v15, %v1547_v47  ;;  %v1460_v12 = vpop.xlane.xlu0 %1459 }
 0x4b1   : > { %v1573_v13 = vsel %vm1159_vm1, %v3148_v49, %v1560_v19  ;;  %v1548_v16 = vsel %vm1539_vm0, %v1460_v12, %v1533_v10  ;;  %v1463_v34 = vpop.xlane.xlu1 %1462 }
 0x4b2   : > { %1586 = vst.msk [vmem:[%s3208_s27 + $0x38] sm:$0xff] %vm1173_vm2, %v1573_v13  ;;  %v1561_v23 = vsel %vm1538_vm3, %v2903_v25, %v1548_v16 }
 0x4b3   : > { %v1574_v15 = vsel %vm1159_vm1, %v3155_v38, %v1561_v23 }
 0x4b4   : > { %1587 = vst.msk [vmem:[%s3208_s27 + $0x40] sm:$0xff] %vm1173_vm2, %v1574_v15  ;;  %v1515_v63 = vpop.xlane.xlu0 %1514 }
 0x4b5   : > { %v1534_v49 = vsub.f32 0.0, %v1515_v63  ;;  %v1518_v14 = vpop.xlane.xlu1 %1517 }
 0x4b6   : > { %v1535_v1 = vsub.f32 0.0, %v1518_v14 }
 0x4b7   : > { %v1549_v3 = vsel %vm1539_vm0, %v1463_v34, %v1534_v49 }
 0x4b8   : > { %v1562_v42 = vsel %vm1538_vm3, %v2906_v27, %v1549_v3  ;;  %v1466_v22 = vpop.xlane.xlu0 %1465 }
 0x4b9   : > { %v1575_v25 = vsel %vm1159_vm1, %v3166_v29, %v1562_v42  ;;  %v1550_v38 = vsel %vm1539_vm0, %v1466_v22, %v1535_v1 }
 0x4ba   : > { %1588 = vst.msk [vmem:[%s3208_s27 + $0x48] sm:$0xff] %vm1173_vm2, %v1575_v25  ;;  %v1563_v44 = vsel %vm1538_vm3, %v2923_v37, %v1550_v38 }
 0x4bb   : > { %v1576_v27 = vsel %vm1159_vm1, %v3173_v20, %v1563_v44 }
 0x4bc   : > { %1589 = vst.msk [vmem:[%s3208_s27 + $0x50] sm:$0xff] %vm1173_vm2, %v1576_v27  ;;  %v1521_v17 = vpop.xlane.xlu0 %1520 }
 0x4bd   : > { %v1524_v39 = vpop.xlane.xlu1 %1523  ;;  %v1536_v45 = vsub.f32 0.0, %v1521_v17 }
 0x4be   : > { %v1537_v29 = vsub.f32 0.0, %v1524_v39 }
 0x4bf   : > { %1598 = sbr.rel (!%p2514_p4) target bundleno = 1283 (0x503), region = 56 }
 0x4c0   : > { %v1472_v9 = vpop.xlane.xlu0 %1471 }
 0x4c1   : > { %v1552_v55 = vsel %vm1539_vm0, %v1472_v9, %v1537_v29  ;;  %v1469_v52 = vpop.xlane.xlu1 %1468 }
 0x4c2   : > { %v1565_v37 = vsel %vm1538_vm3, %v2943_v53, %v1552_v55  ;;  %v1551_v28 = vsel %vm1539_vm0, %v1469_v52, %v1536_v45 }
 0x4c3   : > { %v1578_v20 = vsel %vm1159_vm1, %v3188_v36, %v1565_v37  ;;  %v1564_v24 = vsel %vm1538_vm3, %v2926_v40, %v1551_v28 }
 0x4c4   : > { %1591 = vst.msk [vmem:[%s3208_s27 + $0x60] sm:$0xff] %vm1173_vm2, %v1578_v20  ;;  %v1577_v21 = vsel %vm1159_vm1, %v3182_v31, %v1564_v24 }
 0x4c5   : > { %1590 = vst.msk [vmem:[%s3208_s27 + $0x58] sm:$0xff] %vm1173_vm2, %v1577_v21 }
 0x4c6   : > { %s3438_s15 = smov (!%p1601_p8, %s1600_s15), 13 }
 0x4c7   : > { %s1935_s22 = sshll.u32 %s3438_s15, 7 }
 0x4c8   : > { %p1938_p9 = scmp.eq.s32.totalorder %s1935_s22, 0 }
 0x4c9   : > { %2351 = sdivrem.u32 (!%p1938_p9), %s3438_s15, 13 }
 0x4ca   : > { %1609 = sbr.rel (%p1938_p9) target bundleno = 1283 (0x503), region = 60 }
 0x4d2   : > { %s3345_s13 = spop.drf %2351 }
 0x4d3   : > { %p1939_p10 = scmp.le.s32.totalorder %s3345_s13, 0 }
 0x4d4   : > { %s3431_s30 = smov (!%p1939_p10), %s3339_s21  ;;  %s3432_s16 = smov (!%p1939_p10), %s3208_s27 }
 0x4d5   : > { %1819 = sbr.rel (%p1939_p10) target bundleno = 1254 (0x4e6), region = 139  ;;  %s3354_s23 = smov (!%p1939_p10), 0  }
 0x4d6   : > { %s3356_s24 = smov (!%p1939_p10), 0  }
 0x4dc LB: >> { %v1697_v61 = vld [vmem:[%s2417_s16] sm:$0xff]  ;;  %v1699_v40 = vld [vmem:[%s2417_s16 + $0x8] sm:$0xff]  ;;  %v1701_v53 = vld [vmem:[%s2417_s16 + $0x10] sm:$0xff]  ;;  %s1723_s25 = sadd.s32 1, %s2421_s23  ;;  %s1691_s24 = sadd.s32 1, %s2425_s24   ;;  %s2425_s24 = sphi %s3356_s24, %s1691_s24   ;;  %s2421_s23 = sphi %s3354_s23, %s3433_s23   ;;  %s2417_s16 = sphi %s3432_s16, %s1728_s16   ;;  %s2413_s30 = sphi %s3431_s30, %s1729_s30  }
 0x4dd   : >> { %1698 = vst [vmem:[%s2413_s30] sm:$0xff] %v1697_v61  ;;  %1700 = vst [vmem:[%s2413_s30 + $0x8] sm:$0xff] %v1699_v40  ;;  %v1703_v31 = vld [vmem:[%s2417_s16 + $0x18] sm:$0xff]  ;;  %v1705_v36 = vld [vmem:[%s2417_s16 + $0x20] sm:$0xff]  ;;  %p1724_p11 = scmp.ge.s32.totalorder %s1723_s25, %s3345_s13  ;;  %p1690_p12 = scmp.ge.s32.totalorder %s1691_s24, %s3345_s13 }
 0x4de   : >> { %1702 = vst [vmem:[%s2413_s30 + $0x10] sm:$0xff] %v1701_v53  ;;  %v1707_v5 = vld [vmem:[%s2417_s16 + $0x28] sm:$0xff]  ;;  %1704 = vst [vmem:[%s2413_s30 + $0x18] sm:$0xff] %v1703_v31  ;;  %v1709_v4 = vld [vmem:[%s2417_s16 + $0x30] sm:$0xff] }
 0x4df   : >> { %1706 = vst [vmem:[%s2413_s30 + $0x20] sm:$0xff] %v1705_v36  ;;  %1708 = vst [vmem:[%s2413_s30 + $0x28] sm:$0xff] %v1707_v5  ;;  %v1711_v46 = vld [vmem:[%s2417_s16 + $0x38] sm:$0xff]  ;;  %v1713_v7 = vld [vmem:[%s2417_s16 + $0x40] sm:$0xff]  ;;  %s3440_s25 = smov (%p1724_p11, %s1723_s25), 0  ;;  %1693 = sbr.rel (!%p1690_p12) target bundleno = 1244 (0x4dc), region = 145 }
 0x4e0   : >> { %1710 = vst [vmem:[%s2413_s30 + $0x30] sm:$0xff] %v1709_v4  ;;  %1712 = vst [vmem:[%s2413_s30 + $0x38] sm:$0xff] %v1711_v46  ;;  %v1715_v41 = vld [vmem:[%s2417_s16 + $0x48] sm:$0xff]  ;;  %v1717_v2 = vld [vmem:[%s2417_s16 + $0x50] sm:$0xff]  ;;  %s1726_s29 = smul.u32 104, %s3440_s25  ;;  %s3433_s23 = smov %s3440_s25 }
 0x4e1   : >> { %1714 = vst [vmem:[%s2413_s30 + $0x40] sm:$0xff] %v1713_v7  ;;  %v1719_v11 = vld [vmem:[%s2417_s16 + $0x58] sm:$0xff]  ;;  %1716 = vst [vmem:[%s2413_s30 + $0x48] sm:$0xff] %v1715_v41  ;;  %v1721_v48 = vld [vmem:[%s2417_s16 + $0x60] sm:$0xff] }
 0x4e2   : >> { %1718 = vst [vmem:[%s2413_s30 + $0x50] sm:$0xff] %v1717_v2  ;;  %1720 = vst [vmem:[%s2413_s30 + $0x58] sm:$0xff] %v1719_v11  ;;  %s1728_s16 = scalar_lea.vmem %s3208_s27, %s1726_s29 [#allocation2]  }
 0x4e3   : >> { %1722 = vst [vmem:[%s2413_s30 + $0x60] sm:$0xff] %v1721_v48  ;;  %s1729_s30 = scalar_lea.vmem %s3339_s21, %s1726_s29  }
 0x4e6 PF: > { %2353 = sdivrem.u32 %s3438_s15, 13 }
 0x4e7   : > { %s1940_s14 = smul.u32 104, %s3345_s13 }
 0x4e9   : > { %s1734_s26 = scalar_lea.vmem %s3208_s27, %s1940_s14 [#allocation2]   ;;  %s1736_s10 = scalar_lea.vmem %s3339_s21, %s1940_s14  }
 0x4ef   : > { %s2354_s11 = spop.drf %2353 }
 0x4f0   : > { %p1942_p13 = scmp.le.s32.totalorder %s2354_s11, 0 }
 0x4f1   : > { %s2427_s20 = smov (!%p1942_p13), %s1736_s10   ;;  %s2431_s17 = smov (!%p1942_p13), %s1734_s26  }
 0x4f2   : > { %1833 = sbr.rel (%p1942_p13) target bundleno = 1283 (0x503), region = 150  ;;  %s2435_s18 = smov (!%p1942_p13), 0  }
 0x4f3   : > { %s2439_s19 = smov (!%p1942_p13), 0  }
 0x4f9 LB: >> { %v1746_v59 = vld [vmem:[%s2433_s17] sm:$0xff]  ;;  %s1748_s22 = sadd.s32 1, %s2437_s18  ;;  %s1740_s19 = sadd.s32 1, %s2441_s19   ;;  %s2441_s19 = sphi %s2439_s19, %s1740_s19   ;;  %s2437_s18 = sphi %s2435_s18, %s2436_s18   ;;  %s2433_s17 = sphi %s2431_s17, %s1753_s17   ;;  %s2429_s20 = sphi %s2427_s20, %s1754_s20  }
 0x4fa   : >> { %1747 = vst [vmem:[%s2429_s20] sm:$0xff] %v1746_v59  ;;  %p1749_p0 = scmp.ge.s32.totalorder %s1748_s22, %s2354_s11  ;;  %p1739_p1 = scmp.ge.s32.totalorder %s1740_s19, %s2354_s11 }
 0x4fc   : >> { %s3442_s22 = smov (%p1749_p0, %s1748_s22), 0  ;;  %1742 = sbr.rel (!%p1739_p1) target bundleno = 1273 (0x4f9), region = 156 }
 0x4fd   : >> { %s1943_s27 = sshll.u32 %s3442_s22, 3  ;;  %s2436_s18 = smov %s3442_s22  }
 0x4fe   : >> { %s1753_s17 = scalar_lea.vmem %s1734_s26, %s1943_s27 [#allocation2]   ;;  %s1754_s20 = scalar_lea.vmem %s1736_s10, %s1943_s27  }
 0x503 PF: > { %p15_p2 = scmp.ge.s32.totalorder %s2504_s9, 4   ;;  %s3434_s27 = smov %s2405_s28 }
 0x504   : > { %s3435_s28 = smov %s2512_s12  ;;  %s3436_s29 = smov %s2504_s9 }
 0x505   :  { %17 = sbr.rel (!%p15_p2) target bundleno = 2 (0x2), region = 167 }

</bundles_post_ra>
